<compile_context>
chip_gen: v7x
topology: tpu7x:2x2x1
jax: 0.10.0
libtpu: 0.0.40
codegen_flags: <defaults>
</compile_context>

<pallas_src>
import functools

import jax
import jax.numpy as jnp
import numpy as np
from jax import lax
from jax.experimental import pallas as pl
from jax.experimental.pallas import tpu as pltpu

_LANE = 128
_SUBLANE = 8


def _round_up(x, m):
    return ((x + m - 1) // m) * m


def _pad_to(a, shape):
    return jnp.pad(a, [(0, s - d) for d, s in zip(a.shape, shape)])


def _tile(n, candidates):
    """Largest candidate tile that divides n; falls back to the full extent."""
    for t in candidates:
        if t <= n and n % t == 0:
            return t
    return n


# ----------------------------------------------------------------------------
# Parameter preparation: pad D -> Dp (mult of 128), V -> Vp (mult of 128),
# M -> Mp (mult of 8); cast the big weight matrices to bf16.
# Zero padding is exactly semantics-preserving (see comments in the kernels).
# ----------------------------------------------------------------------------
def prepare_params(params):
    D = params["U"].shape[0]
    V = params["Rw"].shape[1]
    M = params["keys"].shape[0]
    vocab = params["embedding"].shape[0]
    maxlen = params["pos_mask"].shape[0]
    Dp, Vp, Mp = _round_up(D, _LANE), _round_up(V, _LANE), _round_up(M, _SUBLANE)
    f32, bf16 = jnp.float32, jnp.bfloat16
    return dict(
        D=D, V=V, M=M, Dp=Dp, Vp=Vp, Mp=Mp,
        emb=_pad_to(params["embedding"].astype(f32), (vocab, Dp)),
        pos=_pad_to(params["pos_mask"].astype(f32), (maxlen, Dp)),
        keys=_pad_to(params["keys"].astype(f32), (Mp, Dp)),
        U16=_pad_to(params["U"].astype(f32), (Dp, Dp)).astype(bf16),
        V16=_pad_to(params["V"].astype(f32), (Dp, Dp)).astype(bf16),
        W16=_pad_to(params["W"].astype(f32), (Dp, Dp)).astype(bf16),
        Hw16=_pad_to(params["Hw"].astype(f32), (Dp, Dp)).astype(bf16),
        Hb=_pad_to(params["Hb"].astype(f32), (1, Dp)),
        Rw16=_pad_to(params["Rw"].astype(f32), (Dp, Vp)).astype(bf16),
        Rb=_pad_to(params["Rb"].astype(f32), (1, Vp)),
        alpha_mem=jnp.full((1,), params["prelu_mem"], f32),
        alpha_out=jnp.full((1,), params["prelu_out"], f32),
    )


# ----------------------------------------------------------------------------
# Kernel 1: InputEncoder masked word-sum, tiled over sentences (parallel).
#   e_ref   : (tn, W, Dp)  embedded words for tn sentences
#   mask_ref: (W, Dp)      learned positional mask
#   out_ref : (tn, Dp)
# ----------------------------------------------------------------------------
def encoder_kernel(e_ref, mask_ref, out_ref):
    out_ref[...] = jnp.sum(e_ref[...] * mask_ref[...][None, :, :], axis=1)


def encode(tokens, emb_p, pos_p):
    """tokens: (B, S, W) int32 -> (B, S, Dp) float32 (lane-dense)."""
    B, S, W = tokens.shape
    Dp = emb_p.shape[1]
    # TODO(synk): embedding gather stays in plain JAX (no clean rectangular-DMA
    # expression for a vocab-table gather at this size).
    e = emb_p[tokens].astype(jnp.float32).reshape(B * S, W, Dp)
    N = B * S
    tn = _tile(N, (512, 256, 128, 64, 32, 16, 8))
    out = pl.pallas_call(
        encoder_kernel,
        grid=(N // tn,),
        in_specs=[
            pl.BlockSpec((tn, W, Dp), lambda i: (i, 0, 0)),
            pl.BlockSpec((W, Dp), lambda i: (0, 0)),
        ],
        out_specs=pl.BlockSpec((tn, Dp), lambda i: (i, 0)),
        out_shape=jax.ShapeDtypeStruct((N, Dp), jnp.float32),
        compiler_params=pltpu.CompilerParams(dimension_semantics=("parallel",)),
    )(e, pos_p[:W])
    return out.reshape(B, S, Dp)


# ----------------------------------------------------------------------------
# Kernel 2: batched precompute of the non-recurrent projections for all T:
#   sW = s @ W   (TB, Dp)      dot_w = s @ keys^T   (TB, Mp)
# One big MXU pass instead of T tiny (B-row) matmuls inside the recurrence.
# ----------------------------------------------------------------------------
def precompute_kernel(s_ref, keys_ref, W_ref, sw_ref, dw_ref):
    s16 = s_ref[...].astype(jnp.bfloat16)
    k16 = keys_ref[...].astype(jnp.bfloat16)
    sw_ref[...] = jnp.dot(s16, W_ref[...], preferred_element_type=jnp.float32)
    dw_ref[...] = lax.dot_general(
        s16, k16, (((1,), (1,)), ((), ())),
        preferred_element_type=jnp.float32)


def precompute_projections(s_flat, keys_p, W16):
    TB, Dp = s_flat.shape
    Mp = keys_p.shape[0]
    tn = _tile(TB, (512, 256, 128, 64, 32, 16, 8))
    return pl.pallas_call(
        precompute_kernel,
        grid=(TB // tn,),
        in_specs=[
            pl.BlockSpec((tn, Dp), lambda i: (i, 0)),
            pl.BlockSpec((Mp, Dp), lambda i: (0, 0)),
            pl.BlockSpec((Dp, Dp), lambda i: (0, 0)),
        ],
        out_specs=[
            pl.BlockSpec((tn, Dp), lambda i: (i, 0)),
            pl.BlockSpec((tn, Mp), lambda i: (i, 0)),
        ],
        out_shape=[
            jax.ShapeDtypeStruct((TB, Dp), jnp.float32),
            jax.ShapeDtypeStruct((TB, Mp), jnp.float32),
        ],
        compiler_params=pltpu.CompilerParams(dimension_semantics=("parallel",)),
    )(s_flat, keys_p, W16)


# ----------------------------------------------------------------------------
# Kernel 3: DynamicMemory recurrence.  grid = (batch_tiles, T); the memory h
# lives in VMEM scratch across the serial time axis; keys @ V is computed once
# at t == 0 into scratch; only h @ U remains on the per-step critical path.
# ----------------------------------------------------------------------------
def dyn_mem_kernel(s_ref, sw_ref, dw_ref, keys_ref, U_ref, V_ref, alpha_ref,
                   h_out_ref, h_scr, wv_scr):
    t = pl.program_id(1)

    @pl.when(t == 0)
    def _init():
        # reset_memory(): h_j <- key_j for every batch element.
        h_scr[...] = jnp.broadcast_to(keys_ref[...][None, :, :], h_scr.shape)
        # loop-invariant V-projection of the keys (hoisted out of the T loop).
        wv_scr[...] = jnp.dot(keys_ref[...].astype(jnp.bfloat16), V_ref[...],
                              preferred_element_type=jnp.float32)

    tb, Mp, Dp = h_scr.shape
    alpha = alpha_ref[0]                       # PReLU weight from SMEM (scalar path)
    s_t = s_ref[0]                             # (tb, Dp)
    h = h_scr[...]                             # (tb, Mp, Dp)

    # gate: g_j = sigmoid(<s_t, h_j> + <s_t, w_j>)  (the second term was
    # precomputed for all T outside the recurrence).
    g = jax.nn.sigmoid(jnp.sum(h * s_t[:, None, :], axis=-1) + dw_ref[0])

    # candidate: PReLU(U h_j + V w_j + W s_t)   (wV, sW precomputed).
    # (tb, Mp, Dp) -> (tb*Mp, Dp) is a pure leading-dim merge (Mp % 8 == 0,
    # Dp % 128 == 0), i.e. tile-order preserving, and feeds tb*Mp rows into a
    # single MXU matmul.
    hU = jnp.dot(h.reshape(tb * Mp, Dp).astype(jnp.bfloat16), U_ref[...],
                 preferred_element_type=jnp.float32).reshape(tb, Mp, Dp)
    pre = hU + wv_scr[...][None, :, :] + sw_ref[0][:, None, :]
    cand = jnp.where(pre >= 0, pre, alpha * pre)

    # update + L2 normalize (F.normalize semantics, eps = 1e-12), via rsqrt.
    h_new = h + g[:, :, None] * cand
    ssq = jnp.sum(h_new * h_new, axis=-1, keepdims=True)
    h_scr[...] = h_new * lax.rsqrt(jnp.maximum(ssq, 1e-24))

    @pl.when(t == pl.num_programs(1) - 1)
    def _done():
        h_out_ref[...] = h_scr[...]


def dynamic_memory_forward(s_tbd, sw_tbd, dw_tbm, keys_p, U16, V16, alpha):
    """s/sW: (T, B, Dp), dot_w: (T, B, Mp)  ->  final memory (B, Mp, Dp)."""
    T, B, Dp = s_tbd.shape
    Mp = keys_p.shape[0]
    if T == 0:
        raise ValueError("RecurrentEntityNetwork: story length T must be >= 1")
    tb = _tile(B, (64, 32, 16, 8))
    return pl.pallas_call(
        dyn_mem_kernel,
        grid=(B // tb, T),
        in_specs=[
            pl.BlockSpec((1, tb, Dp), lambda b, t: (t, b, 0)),   # s_t
            pl.BlockSpec((1, tb, Dp), lambda b, t: (t, b, 0)),   # sW_t
            pl.BlockSpec((1, tb, Mp), lambda b, t: (t, b, 0)),   # dot_w_t
            pl.BlockSpec((Mp, Dp), lambda b, t: (0, 0)),          # keys
            pl.BlockSpec((Dp, Dp), lambda b, t: (0, 0)),          # U (bf16)
            pl.BlockSpec((Dp, Dp), lambda b, t: (0, 0)),          # V (bf16)
            pl.BlockSpec(memory_space=pltpu.MemorySpace.SMEM),    # prelu alpha
        ],
        out_specs=pl.BlockSpec((tb, Mp, Dp), lambda b, t: (b, 0, 0)),
        out_shape=jax.ShapeDtypeStruct((B, Mp, Dp), jnp.float32),
        scratch_shapes=[
            pltpu.VMEM((tb, Mp, Dp), jnp.float32),   # resident memory state
            pltpu.VMEM((Mp, Dp), jnp.float32),       # keys @ V (loop invariant)
        ],
        compiler_params=pltpu.CompilerParams(
            dimension_semantics=("parallel", "arbitrary")),
    )(s_tbd, sw_tbd, dw_tbm, keys_p, U16, V16, alpha)


# ----------------------------------------------------------------------------
# Kernel 4: OutputModule, tiled over the (padded) vocab dimension.
#   p = softmax_j(<q, h_j>); u = sum_j p_j h_j; y = PReLU(q + H u) @ R + b
# The attention/PReLU part is vocab-invariant -> computed once at v == 0 into
# a VMEM scratch; each vocab tile then does one lane-dense matmul.
# ----------------------------------------------------------------------------
def output_kernel(q_ref, h_ref, Hw_ref, Hb_ref, Rw_ref, Rb_ref, alpha_ref,
                  y_ref, act_scr, *, m_valid):
    v = pl.program_id(0)

    @pl.when(v == 0)
    def _attend():
        q = q_ref[...]                     # (B, Dp)
        h = h_ref[...]                     # (B, Mp, Dp)
        alpha = alpha_ref[0]
        scores = jnp.sum(h * q[:, None, :], axis=-1)                 # (B, Mp)
        # mask out the zero-padded (phantom) memory slots
        slot = lax.broadcasted_iota(jnp.int32, scores.shape, 1)
        scores = jnp.where(slot < m_valid, scores, -1e30)
        scores = scores - jnp.max(scores, axis=-1, keepdims=True)
        p = jnp.exp(scores)
        p = p / jnp.sum(p, axis=-1, keepdims=True)
        u = jnp.sum(p[:, :, None] * h, axis=1)                       # (B, Dp)
        pre = q + jnp.dot(u.astype(jnp.bfloat16), Hw_ref[...],
                          preferred_element_type=jnp.float32) + Hb_ref[0]
        act_scr[...] = jnp.where(pre >= 0, pre, alpha * pre)          # PReLU

    y_ref[...] = jnp.dot(act_scr[...].astype(jnp.bfloat16), Rw_ref[...],
                         preferred_element_type=jnp.float32) + Rb_ref[0]


def output_forward(q, h, Hw16, Hb_p, Rw16, Rb_p, alpha, m_valid):
    B, Dp = q.shape
    Mp = h.shape[1]
    Vp = Rw16.shape[1]
    tv = _tile(Vp, (512, 256, 128))
    return pl.pallas_call(
        functools.partial(output_kernel, m_valid=m_valid),
        grid=(Vp // tv,),
        in_specs=[
            pl.BlockSpec((B, Dp), lambda v: (0, 0)),
            pl.BlockSpec((B, Mp, Dp), lambda v: (0, 0, 0)),
            pl.BlockSpec((Dp, Dp), lambda v: (0, 0)),
            pl.BlockSpec((1, Dp), lambda v: (0, 0)),
            pl.BlockSpec((Dp, tv), lambda v: (0, v)),
            pl.BlockSpec((1, tv), lambda v: (0, v)),
            pl.BlockSpec(memory_space=pltpu.MemorySpace.SMEM),   # prelu alpha
        ],
        out_specs=pl.BlockSpec((B, tv), lambda v: (0, v)),
        out_shape=jax.ShapeDtypeStruct((B, Vp), jnp.float32),
        scratch_shapes=[pltpu.VMEM((B, Dp), jnp.float32)],
        compiler_params=pltpu.CompilerParams(dimension_semantics=("arbitrary",)),
    )(q, h, Hw16, Hb_p, Rw16, Rb_p, alpha)


# ----------------------------------------------------------------------------
# Full forward
# ----------------------------------------------------------------------------
def entnet_forward(q_tokens, text_tokens, params):
    pp = prepare_params(params)
    B, T, _ = text_tokens.shape
    Dp, Mp = pp["Dp"], pp["Mp"]

    s_enc = encode(text_tokens, pp["emb"], pp["pos"])                # (B, T, Dp)
    q_vec = encode(q_tokens[:, None, :], pp["emb"], pp["pos"])[:, 0, :]  # (B, Dp)

    s_tbd = jnp.transpose(s_enc, (1, 0, 2))                          # (T, B, Dp)
    s_flat = s_tbd.reshape(T * B, Dp)
    sw_flat, dw_flat = precompute_projections(s_flat, pp["keys"], pp["W16"])
    sw_tbd = sw_flat.reshape(T, B, Dp)
    dw_tbm = dw_flat.reshape(T, B, Mp)

    h = dynamic_memory_forward(s_tbd, sw_tbd, dw_tbm, pp["keys"],
                               pp["U16"], pp["V16"], pp["alpha_mem"])
    y = output_forward(q_vec, h, pp["Hw16"], pp["Hb"], pp["Rw16"], pp["Rb"],
                       pp["alpha_out"], pp["M"])
    return y[:, : pp["V"]]


# ----------------------------------------------------------------------------
# Pure-JAX reference.  weights_dtype=jnp.float32 reproduces the torch module's
# all-f32 math; weights_dtype=jnp.bfloat16 mirrors the kernel's numerical
# scheme (bf16 matmul operands, f32 accumulation) for a tight comparison.
# ----------------------------------------------------------------------------
def entnet_reference(q_tokens, text_tokens, params, weights_dtype=jnp.float32):
    emb, pos = params["embedding"], params["pos_mask"]
    wd = weights_dtype
    U = params["U"].astype(wd)
    Vm = params["V"].astype(wd)
    Wm = params["W"].astype(wd)
    Hw = params["Hw"].astype(wd)
    Rw = params["Rw"].astype(wd)
    keys = params["keys"]
    keys_w = keys.astype(wd)

    def enc(tok):
        e = emb[tok] * pos[: tok.shape[-1]][None, None]
        return e.sum(axis=2)

    def prelu(x, a):
        return jnp.where(x >= 0, x, a * x)

    def mm(a, b):
        return jnp.dot(a.astype(wd), b, preferred_element_type=jnp.float32)

    s = enc(text_tokens)                                  # (B, T, D)
    q = enc(q_tokens[:, None, :])[:, 0]                   # (B, D)
    a_m = params["prelu_mem"]
    B, T, D = s.shape
    M = keys.shape[0]
    h = jnp.broadcast_to(keys[None], (B, M, D)).astype(jnp.float32)
    wV = mm(keys, Vm)
    for t in range(T):
        st = s[:, t, :]
        g = jax.nn.sigmoid(jnp.sum(h * st[:, None, :], -1) + mm(st, keys_w.T))
        cand = prelu(mm(h, U) + wV[None] + mm(st, Wm)[:, None, :], a_m)
        h = h + g[:, :, None] * cand
        h = h / jnp.maximum(jnp.sqrt(jnp.sum(h * h, -1, keepdims=True)), 1e-12)
    scores = jnp.sum(h * q[:, None, :], -1)
    p = jax.nn.softmax(scores, axis=-1)
    u = jnp.sum(p[:, :, None] * h, axis=1)
    act = prelu(q + mm(u, Hw) + params["Hb"][0], params["prelu_out"])
    return mm(act, Rw) + params["Rb"][0]


def init_params(key, vocab, dim, max_len, n_blocks):
    ks = jax.random.split(key, 8)
    sc = 0.1
    return {
        "embedding": jax.random.normal(ks[0], (vocab, dim), jnp.float32) * sc,
        "pos_mask": jnp.ones((max_len, dim), jnp.float32),
        "keys": jax.random.normal(ks[1], (n_blocks, dim), jnp.float32) * sc,
        "U": jax.random.normal(ks[2], (dim, dim), jnp.float32) * sc,
        "V": jax.random.normal(ks[3], (dim, dim), jnp.float32) * sc,
        "W": jax.random.normal(ks[4], (dim, dim), jnp.float32) * sc,
        "Hw": jax.random.normal(ks[5], (dim, dim), jnp.float32) * sc,
        "Hb": jnp.zeros((1, dim), jnp.float32),
        "Rw": jax.random.normal(ks[6], (dim, vocab), jnp.float32) * sc,
        "Rb": jnp.zeros((1, vocab), jnp.float32),
        "prelu_mem": 0.25,   # nn.PReLU() default
        "prelu_out": 0.25,
    }


if __name__ == "__main__":
    # Small shapes consistent with the module's forward:
    B, T, W = 2, 8, 6          # batch, story sentences, words per sentence
    VOCAB, D, MAXLEN, M = 64, 32, 20, 8

    root = jax.random.PRNGKey(0)
    k_text, k_q, k_param = jax.random.split(root, 3)
    text = jax.random.randint(k_text, (B, T, W), 0, VOCAB, dtype=jnp.int32)
    query = jax.random.randint(k_q, (B, W), 0, VOCAB, dtype=jnp.int32)
    params = init_params(k_param, VOCAB, D, MAXLEN, M)

    y = jax.jit(entnet_forward)(query, text, params)
    y = jax.block_until_ready(y)
    assert y.shape == (B, VOCAB)

    # Tight check vs. a reference that mirrors the kernel's precision scheme
    # (bf16 matmul operands, f32 accumulation) -- residual is accumulation
    # order drift through the T-step recurrence only.
    y_ref16 = entnet_reference(query, text, params, weights_dtype=jnp.bfloat16)
    np.testing.assert_allclose(np.asarray(y), np.asarray(y_ref16),
                               rtol=2e-3, atol=2e-3)

    # Sanity check vs. the pure-f32 torch-semantics reference; the gap here is
    # the intentional bf16 weight quantization.
    y_ref32 = entnet_reference(query, text, params, weights_dtype=jnp.float32)
    np.testing.assert_allclose(np.asarray(y), np.asarray(y_ref32),
                               rtol=5e-2, atol=5e-2)
    print("KERNEL_OK")
</pallas_src>

<mosaic_0001>
module attributes {stable_mosaic.version = 11 : i64} {
  func.func @encoder_kernel(%arg0: i32, %arg1: memref<2x6x128xf32, #tpu.memory_space<vmem>>, %arg2: memref<6x128xf32, #tpu.memory_space<vmem>>, %arg3: memref<2x128xf32, #tpu.memory_space<vmem>>) attributes {dimension_semantics = [#tpu.dimension_semantics<parallel>], iteration_bounds = array<i64: 1>, scalar_prefetch = 0 : i64, scratch_operands = 0 : i64, tpu.core_type = #tpu.core_type<tc>, window_params = [{transform_indices = @transform_0, window_bounds = array<i64: 2, 6, 128>}, {pipeline_mode = #tpu.pipeline_mode<synchronous>, transform_indices = @transform_1, window_bounds = array<i64: 6, 128>}, {transform_indices = @transform_2, window_bounds = array<i64: 2, 128>}]} {
    %c0 = arith.constant 0 : index
    %c0_0 = arith.constant 0 : index
    %c0_1 = arith.constant 0 : index
    %0 = vector.load %arg1[%c0, %c0_0, %c0_1] : memref<2x6x128xf32, #tpu.memory_space<vmem>>, vector<2x6x128xf32>
    %c0_2 = arith.constant 0 : index
    %c0_3 = arith.constant 0 : index
    %1 = vector.load %arg2[%c0_2, %c0_3] : memref<6x128xf32, #tpu.memory_space<vmem>>, vector<6x128xf32>
    %2 = vector.shape_cast %1 : vector<6x128xf32> to vector<1x6x128xf32>
    %3 = vector.broadcast %2 : vector<1x6x128xf32> to vector<2x6x128xf32>
    %4 = arith.mulf %0, %3 : vector<2x6x128xf32>
    %cst = arith.constant dense<0.000000e+00> : vector<2x128xf32>
    %5 = vector.multi_reduction <add>, %4, %cst [1] : vector<2x6x128xf32> to vector<2x128xf32>
    %c0_4 = arith.constant 0 : index
    %c0_5 = arith.constant 0 : index
    %6 = vector.load %arg3[%c0_4, %c0_5] : memref<2x128xf32, #tpu.memory_space<vmem>>, vector<2x128xf32>
    tpu.vector_store %arg3[%c0_4, %c0_5], %5 {strides = array<i32>} : memref<2x128xf32, #tpu.memory_space<vmem>>, vector<2x128xf32>,
    return
  }
  func.func @transform_0(%arg0: i32) -> (i32, i32, i32) {
    %c0_i32 = arith.constant 0 : i32
    %c0_i32_0 = arith.constant 0 : i32
    %c0_i32_1 = arith.constant 0 : i32
    return %arg0, %c0_i32, %c0_i32_0 : i32, i32, i32
  }
  func.func @transform_1(%arg0: i32) -> (i32, i32) {
    %c0_i32 = arith.constant 0 : i32
    %c0_i32_0 = arith.constant 0 : i32
    %c0_i32_1 = arith.constant 0 : i32
    return %c0_i32, %c0_i32_0 : i32, i32
  }
  func.func @transform_2(%arg0: i32) -> (i32, i32) {
    %c0_i32 = arith.constant 0 : i32
    %c0_i32_0 = arith.constant 0 : i32
    return %arg0, %c0_i32 : i32, i32
  }
}

module attributes {stable_mosaic.version = 11 : i64} {
  func.func @encoder_kernel(%arg0: i32, %arg1: memref<16x6x128xf32, #tpu.memory_space<vmem>>, %arg2: memref<6x128xf32, #tpu.memory_space<vmem>>, %arg3: memref<16x128xf32, #tpu.memory_space<vmem>>) attributes {dimension_semantics = [#tpu.dimension_semantics<parallel>], iteration_bounds = array<i64: 1>, scalar_prefetch = 0 : i64, scratch_operands = 0 : i64, tpu.core_type = #tpu.core_type<tc>, window_params = [{transform_indices = @transform_0, window_bounds = array<i64: 16, 6, 128>}, {pipeline_mode = #tpu.pipeline_mode<synchronous>, transform_indices = @transform_1, window_bounds = array<i64: 6, 128>}, {transform_indices = @transform_2, window_bounds = array<i64: 16, 128>}]} {
    %c0 = arith.constant 0 : index
    %c0_0 = arith.constant 0 : index
    %c0_1 = arith.constant 0 : index
    %0 = vector.load %arg1[%c0, %c0_0, %c0_1] : memref<16x6x128xf32, #tpu.memory_space<vmem>>, vector<16x6x128xf32>
    %c0_2 = arith.constant 0 : index
    %c0_3 = arith.constant 0 : index
    %1 = vector.load %arg2[%c0_2, %c0_3] : memref<6x128xf32, #tpu.memory_space<vmem>>, vector<6x128xf32>
    %2 = vector.shape_cast %1 : vector<6x128xf32> to vector<1x6x128xf32>
    %3 = vector.broadcast %2 : vector<1x6x128xf32> to vector<16x6x128xf32>
    %4 = arith.mulf %0, %3 : vector<16x6x128xf32>
    %cst = arith.constant dense<0.000000e+00> : vector<16x128xf32>
    %5 = vector.multi_reduction <add>, %4, %cst [1] : vector<16x6x128xf32> to vector<16x128xf32>
    %c0_4 = arith.constant 0 : index
    %c0_5 = arith.constant 0 : index
    %6 = vector.load %arg3[%c0_4, %c0_5] : memref<16x128xf32, #tpu.memory_space<vmem>>, vector<16x128xf32>
    tpu.vector_store %arg3[%c0_4, %c0_5], %5 {strides = array<i32>} : memref<16x128xf32, #tpu.memory_space<vmem>>, vector<16x128xf32>,
    return
  }
  func.func @transform_0(%arg0: i32) -> (i32, i32, i32) {
    %c0_i32 = arith.constant 0 : i32
    %c0_i32_0 = arith.constant 0 : i32
    %c0_i32_1 = arith.constant 0 : i32
    return %arg0, %c0_i32, %c0_i32_0 : i32, i32, i32
  }
  func.func @transform_1(%arg0: i32) -> (i32, i32) {
    %c0_i32 = arith.constant 0 : i32
    %c0_i32_0 = arith.constant 0 : i32
    %c0_i32_1 = arith.constant 0 : i32
    return %c0_i32, %c0_i32_0 : i32, i32
  }
  func.func @transform_2(%arg0: i32) -> (i32, i32) {
    %c0_i32 = arith.constant 0 : i32
    %c0_i32_0 = arith.constant 0 : i32
    return %arg0, %c0_i32 : i32, i32
  }
}

module attributes {stable_mosaic.version = 11 : i64} {
  func.func @precompute_kernel(%arg0: i32, %arg1: memref<16x128xf32, #tpu.memory_space<vmem>>, %arg2: memref<8x128xf32, #tpu.memory_space<vmem>>, %arg3: memref<128x128xbf16, #tpu.memory_space<vmem>>, %arg4: memref<16x128xf32, #tpu.memory_space<vmem>>, %arg5: memref<16x8xf32, #tpu.memory_space<vmem>>) attributes {dimension_semantics = [#tpu.dimension_semantics<parallel>], iteration_bounds = array<i64: 1>, scalar_prefetch = 0 : i64, scratch_operands = 0 : i64, tpu.core_type = #tpu.core_type<tc>, window_params = [{transform_indices = @transform_0, window_bounds = array<i64: 16, 128>}, {pipeline_mode = #tpu.pipeline_mode<synchronous>, transform_indices = @transform_1, window_bounds = array<i64: 8, 128>}, {pipeline_mode = #tpu.pipeline_mode<synchronous>, transform_indices = @transform_2, window_bounds = array<i64: 128, 128>}, {transform_indices = @transform_3, window_bounds = array<i64: 16, 128>}, {transform_indices = @transform_4, window_bounds = array<i64: 16, 8>}]} {
    %c0 = arith.constant 0 : index
    %c0_0 = arith.constant 0 : index
    %0 = vector.load %arg1[%c0, %c0_0] : memref<16x128xf32, #tpu.memory_space<vmem>>, vector<16x128xf32>
    %1 = arith.truncf %0 : vector<16x128xf32> to vector<16x128xbf16>
    %c0_1 = arith.constant 0 : index
    %c0_2 = arith.constant 0 : index
    %2 = vector.load %arg2[%c0_1, %c0_2] : memref<8x128xf32, #tpu.memory_space<vmem>>, vector<8x128xf32>
    %3 = arith.truncf %2 : vector<8x128xf32> to vector<8x128xbf16>
    %c0_3 = arith.constant 0 : index
    %c0_4 = arith.constant 0 : index
    %4 = vector.load %arg3[%c0_3, %c0_4] : memref<128x128xbf16, #tpu.memory_space<vmem>>, vector<128x128xbf16>
    %cst = arith.constant dense<0.000000e+00> : vector<16x128xf32>
    %5 = tpu.matmul %1, %4, %cst {dimension_numbers = #tpu.dot_dimension_numbers<[1], [0], [0], [1], [0, 0, 1, 1], [], []>} : vector<16x128xbf16>, vector<128x128xbf16>, vector<16x128xf32> -> vector<16x128xf32>
    %c0_5 = arith.constant 0 : index
    %c0_6 = arith.constant 0 : index
    %6 = vector.load %arg4[%c0_5, %c0_6] : memref<16x128xf32, #tpu.memory_space<vmem>>, vector<16x128xf32>
    tpu.vector_store %arg4[%c0_5, %c0_6], %5 {strides = array<i32>} : memref<16x128xf32, #tpu.memory_space<vmem>>, vector<16x128xf32>,
    %cst_7 = arith.constant dense<0.000000e+00> : vector<16x8xf32>
    %7 = tpu.matmul %1, %3, %cst_7 {dimension_numbers = #tpu.dot_dimension_numbers<[1], [1], [0], [0], [0, 0, 1, 0], [], []>} : vector<16x128xbf16>, vector<8x128xbf16>, vector<16x8xf32> -> vector<16x8xf32>
    %c0_8 = arith.constant 0 : index
    %c0_9 = arith.constant 0 : index
    %8 = vector.load %arg5[%c0_8, %c0_9] : memref<16x8xf32, #tpu.memory_space<vmem>>, vector<16x8xf32>
    tpu.vector_store %arg5[%c0_8, %c0_9], %7 {strides = array<i32>} : memref<16x8xf32, #tpu.memory_space<vmem>>, vector<16x8xf32>,
    return
  }
  func.func @transform_0(%arg0: i32) -> (i32, i32) {
    %c0_i32 = arith.constant 0 : i32
    %c0_i32_0 = arith.constant 0 : i32
    return %arg0, %c0_i32 : i32, i32
  }
  func.func @transform_1(%arg0: i32) -> (i32, i32) {
    %c0_i32 = arith.constant 0 : i32
    %c0_i32_0 = arith.constant 0 : i32
    %c0_i32_1 = arith.constant 0 : i32
    return %c0_i32, %c0_i32_0 : i32, i32
  }
  func.func @transform_2(%arg0: i32) -> (i32, i32) {
    %c0_i32 = arith.constant 0 : i32
    %c0_i32_0 = arith.constant 0 : i32
    %c0_i32_1 = arith.constant 0 : i32
    return %c0_i32, %c0_i32_0 : i32, i32
  }
  func.func @transform_3(%arg0: i32) -> (i32, i32) {
    %c0_i32 = arith.constant 0 : i32
    %c0_i32_0 = arith.constant 0 : i32
    return %arg0, %c0_i32 : i32, i32
  }
  func.func @transform_4(%arg0: i32) -> (i32, i32) {
    %c0_i32 = arith.constant 0 : i32
    %c0_i32_0 = arith.constant 0 : i32
    return %arg0, %c0_i32 : i32, i32
  }
}

module attributes {stable_mosaic.version = 11 : i64} {
  func.func @dyn_mem_kernel(%arg0: i32, %arg1: i32, %arg2: memref<1x2x128xf32, #tpu.memory_space<vmem>>, %arg3: memref<1x2x128xf32, #tpu.memory_space<vmem>>, %arg4: memref<1x2x8xf32, #tpu.memory_space<vmem>>, %arg5: memref<8x128xf32, #tpu.memory_space<vmem>>, %arg6: memref<128x128xbf16, #tpu.memory_space<vmem>>, %arg7: memref<128x128xbf16, #tpu.memory_space<vmem>>, %arg8: memref<1xf32, #tpu.memory_space<smem>>, %arg9: memref<2x8x128xf32, #tpu.memory_space<vmem>>, %arg10: memref<2x8x128xf32, #tpu.memory_space<vmem>>, %arg11: memref<8x128xf32, #tpu.memory_space<vmem>>) attributes {dimension_semantics = [#tpu.dimension_semantics<parallel>, #tpu.dimension_semantics<arbitrary>], iteration_bounds = array<i64: 1, 8>, scalar_prefetch = 0 : i64, scratch_operands = 2 : i64, tpu.core_type = #tpu.core_type<tc>, window_params = [{transform_indices = @transform_0, window_bounds = array<i64: 1, 2, 128>}, {transform_indices = @transform_1, window_bounds = array<i64: 1, 2, 128>}, {transform_indices = @transform_2, window_bounds = array<i64: 1, 2, 8>}, {pipeline_mode = #tpu.pipeline_mode<synchronous>, transform_indices = @transform_3, window_bounds = array<i64: 8, 128>}, {pipeline_mode = #tpu.pipeline_mode<synchronous>, transform_indices = @transform_4, window_bounds = array<i64: 128, 128>}, {pipeline_mode = #tpu.pipeline_mode<synchronous>, transform_indices = @transform_5, window_bounds = array<i64: 128, 128>}, {transform_indices = @transform_6, window_bounds = array<i64: 1>}, {transform_indices = @transform_7, window_bounds = array<i64: 2, 8, 128>}]} {
    %c0_i32 = arith.constant 0 : i32
    %0 = arith.cmpi eq, %arg1, %c0_i32 : i32
    %1 = arith.extui %0 : i1 to i32
    %c0_i32_0 = arith.constant 0 : i32
    %2 = arith.cmpi ne, %1, %c0_i32_0 : i32
    scf.if %2 {
      %c0_26 = arith.constant 0 : index
      %c0_27 = arith.constant 0 : index
      %54 = vector.load %arg5[%c0_26, %c0_27] : memref<8x128xf32, #tpu.memory_space<vmem>>, vector<8x128xf32>
      %55 = vector.shape_cast %54 : vector<8x128xf32> to vector<1x8x128xf32>
      %56 = vector.shape_cast %55 : vector<1x8x128xf32> to vector<1x8x128xf32>
      %57 = vector.broadcast %56 : vector<1x8x128xf32> to vector<2x8x128xf32>
      %c0_28 = arith.constant 0 : index
      %c0_29 = arith.constant 0 : index
      %c0_30 = arith.constant 0 : index
      %58 = vector.load %arg10[%c0_28, %c0_29, %c0_30] : memref<2x8x128xf32, #tpu.memory_space<vmem>>, vector<2x8x128xf32>
      tpu.vector_store %arg10[%c0_28, %c0_29, %c0_30], %57 {strides = array<i32>} : memref<2x8x128xf32, #tpu.memory_space<vmem>>, vector<2x8x128xf32>,
      %c0_31 = arith.constant 0 : index
      %c0_32 = arith.constant 0 : index
      %59 = vector.load %arg5[%c0_31, %c0_32] : memref<8x128xf32, #tpu.memory_space<vmem>>, vector<8x128xf32>
      %60 = arith.truncf %59 : vector<8x128xf32> to vector<8x128xbf16>
      %c0_33 = arith.constant 0 : index
      %c0_34 = arith.constant 0 : index
      %61 = vector.load %arg7[%c0_33, %c0_34] : memref<128x128xbf16, #tpu.memory_space<vmem>>, vector<128x128xbf16>
      %cst_35 = arith.constant dense<0.000000e+00> : vector<8x128xf32>
      %62 = tpu.matmul %60, %61, %cst_35 {dimension_numbers = #tpu.dot_dimension_numbers<[1], [0], [0], [1], [0, 0, 1, 1], [], []>} : vector<8x128xbf16>, vector<128x128xbf16>, vector<8x128xf32> -> vector<8x128xf32>
      %c0_36 = arith.constant 0 : index
      %c0_37 = arith.constant 0 : index
      %63 = vector.load %arg11[%c0_36, %c0_37] : memref<8x128xf32, #tpu.memory_space<vmem>>, vector<8x128xf32>
      tpu.vector_store %arg11[%c0_36, %c0_37], %62 {strides = array<i32>} : memref<8x128xf32, #tpu.memory_space<vmem>>, vector<8x128xf32>,
    } else {
    }
    %c0 = arith.constant 0 : index
    %3 = memref.load %arg8[%c0] : memref<1xf32, #tpu.memory_space<smem>>
    %c0_1 = arith.constant 0 : index
    %c0_2 = arith.constant 0 : index
    %c0_3 = arith.constant 0 : index
    %4 = vector.load %arg2[%c0_1, %c0_2, %c0_3] : memref<1x2x128xf32, #tpu.memory_space<vmem>>, vector<1x2x128xf32>
    %5 = vector.shape_cast %4 : vector<1x2x128xf32> to vector<2x128xf32>
    %c0_4 = arith.constant 0 : index
    %c0_5 = arith.constant 0 : index
    %c0_6 = arith.constant 0 : index
    %6 = vector.load %arg10[%c0_4, %c0_5, %c0_6] : memref<2x8x128xf32, #tpu.memory_space<vmem>>, vector<2x8x128xf32>
    %7 = vector.shape_cast %5 : vector<2x128xf32> to vector<2x1x128xf32>
    %8 = vector.broadcast %7 : vector<2x1x128xf32> to vector<2x8x128xf32>
    %9 = arith.mulf %6, %8 : vector<2x8x128xf32>
    %cst = arith.constant dense<0.000000e+00> : vector<2x8xf32>
    %10 = vector.multi_reduction <add>, %9, %cst [2] : vector<2x8x128xf32> to vector<2x8xf32>
    %c0_7 = arith.constant 0 : index
    %c0_8 = arith.constant 0 : index
    %c0_9 = arith.constant 0 : index
    %11 = vector.load %arg4[%c0_7, %c0_8, %c0_9] : memref<1x2x8xf32, #tpu.memory_space<vmem>>, vector<1x2x8xf32>
    %12 = vector.shape_cast %11 : vector<1x2x8xf32> to vector<2x8xf32>
    %13 = arith.addf %10, %12 : vector<2x8xf32>
    %14 = arith.negf %13 : vector<2x8xf32>
    %15 = math.exp %14 : vector<2x8xf32>
    %cst_10 = arith.constant 1.000000e+00 : f32
    %16 = vector.broadcast %cst_10 : f32 to vector<2x8xf32>
    %17 = arith.addf %16, %15 : vector<2x8xf32>
    %18 = arith.divf %16, %17 : vector<2x8xf32>
    %19 = vector.shape_cast %6 : vector<2x8x128xf32> to vector<16x128xf32>
    %20 = arith.truncf %19 : vector<16x128xf32> to vector<16x128xbf16>
    %c0_11 = arith.constant 0 : index
    %c0_12 = arith.constant 0 : index
    %21 = vector.load %arg6[%c0_11, %c0_12] : memref<128x128xbf16, #tpu.memory_space<vmem>>, vector<128x128xbf16>
    %cst_13 = arith.constant dense<0.000000e+00> : vector<16x128xf32>
    %22 = tpu.matmul %20, %21, %cst_13 {dimension_numbers = #tpu.dot_dimension_numbers<[1], [0], [0], [1], [0, 0, 1, 1], [], []>} : vector<16x128xbf16>, vector<128x128xbf16>, vector<16x128xf32> -> vector<16x128xf32>
    %23 = vector.shape_cast %22 : vector<16x128xf32> to vector<2x8x128xf32>
    %c0_14 = arith.constant 0 : index
    %c0_15 = arith.constant 0 : index
    %24 = vector.load %arg11[%c0_14, %c0_15] : memref<8x128xf32, #tpu.memory_space<vmem>>, vector<8x128xf32>
    %25 = vector.shape_cast %24 : vector<8x128xf32> to vector<1x8x128xf32>
    %26 = vector.broadcast %25 : vector<1x8x128xf32> to vector<2x8x128xf32>
    %27 = arith.addf %23, %26 : vector<2x8x128xf32>
    %c0_16 = arith.constant 0 : index
    %c0_17 = arith.constant 0 : index
    %c0_18 = arith.constant 0 : index
    %28 = vector.load %arg3[%c0_16, %c0_17, %c0_18] : memref<1x2x128xf32, #tpu.memory_space<vmem>>, vector<1x2x128xf32>
    %29 = vector.shape_cast %28 : vector<1x2x128xf32> to vector<2x128xf32>
    %30 = vector.shape_cast %29 : vector<2x128xf32> to vector<2x1x128xf32>
    %31 = vector.broadcast %30 : vector<2x1x128xf32> to vector<2x8x128xf32>
    %32 = arith.addf %27, %31 : vector<2x8x128xf32>
    %cst_19 = arith.constant 0.000000e+00 : f32
    %33 = vector.broadcast %cst_19 : f32 to vector<2x8x128xf32>
    %34 = arith.cmpf oge, %32, %33 : vector<2x8x128xf32>
    %35 = vector.broadcast %3 : f32 to vector<2x8x128xf32>
    %36 = arith.mulf %35, %32 : vector<2x8x128xf32>
    %37 = arith.select %34, %32, %36 : vector<2x8x128xi1>, vector<2x8x128xf32>
    %38 = vector.shape_cast %18 : vector<2x8xf32> to vector<2x8x1xf32>
    %39 = vector.broadcast %38 : vector<2x8x1xf32> to vector<2x8x128xf32>
    %40 = arith.mulf %39, %37 : vector<2x8x128xf32>
    %41 = arith.addf %6, %40 : vector<2x8x128xf32>
    %42 = arith.mulf %41, %41 : vector<2x8x128xf32>
    %cst_20 = arith.constant dense<0.000000e+00> : vector<2x8xf32>
    %43 = vector.multi_reduction <add>, %42, %cst_20 [2] : vector<2x8x128xf32> to vector<2x8xf32>
    %44 = vector.shape_cast %43 : vector<2x8xf32> to vector<2x8x1xf32>
    %cst_21 = arith.constant 1.000000e-24 : f32
    %45 = vector.broadcast %cst_21 : f32 to vector<2x8x1xf32>
    %46 = arith.maximumf %44, %45 : vector<2x8x1xf32>
    %47 = math.rsqrt %46 : vector<2x8x1xf32>
    %48 = vector.broadcast %47 : vector<2x8x1xf32> to vector<2x8x128xf32>
    %49 = arith.mulf %41, %48 : vector<2x8x128xf32>
    %c0_22 = arith.constant 0 : index
    %c0_23 = arith.constant 0 : index
    %c0_24 = arith.constant 0 : index
    %50 = vector.load %arg10[%c0_22, %c0_23, %c0_24] : memref<2x8x128xf32, #tpu.memory_space<vmem>>, vector<2x8x128xf32>
    tpu.vector_store %arg10[%c0_22, %c0_23, %c0_24], %49 {strides = array<i32>} : memref<2x8x128xf32, #tpu.memory_space<vmem>>, vector<2x8x128xf32>,
    %c7_i32 = arith.constant 7 : i32
    %51 = arith.cmpi eq, %arg1, %c7_i32 : i32
    %52 = arith.extui %51 : i1 to i32
    %c0_i32_25 = arith.constant 0 : i32
    %53 = arith.cmpi ne, %52, %c0_i32_25 : i32
    scf.if %53 {
      %c0_26 = arith.constant 0 : index
      %c0_27 = arith.constant 0 : index
      %c0_28 = arith.constant 0 : index
      %54 = vector.load %arg10[%c0_26, %c0_27, %c0_28] : memref<2x8x128xf32, #tpu.memory_space<vmem>>, vector<2x8x128xf32>
      %c0_29 = arith.constant 0 : index
      %c0_30 = arith.constant 0 : index
      %c0_31 = arith.constant 0 : index
      %55 = vector.load %arg9[%c0_29, %c0_30, %c0_31] : memref<2x8x128xf32, #tpu.memory_space<vmem>>, vector<2x8x128xf32>
      tpu.vector_store %arg9[%c0_29, %c0_30, %c0_31], %54 {strides = array<i32>} : memref<2x8x128xf32, #tpu.memory_space<vmem>>, vector<2x8x128xf32>,
    } else {
    }
    return
  }
  func.func @transform_0(%arg0: i32, %arg1: i32) -> (i32, i32, i32) {
    %c0_i32 = arith.constant 0 : i32
    %c0_i32_0 = arith.constant 0 : i32
    return %arg1, %arg0, %c0_i32 : i32, i32, i32
  }
  func.func @transform_1(%arg0: i32, %arg1: i32) -> (i32, i32, i32) {
    %c0_i32 = arith.constant 0 : i32
    %c0_i32_0 = arith.constant 0 : i32
    return %arg1, %arg0, %c0_i32 : i32, i32, i32
  }
  func.func @transform_2(%arg0: i32, %arg1: i32) -> (i32, i32, i32) {
    %c0_i32 = arith.constant 0 : i32
    %c0_i32_0 = arith.constant 0 : i32
    return %arg1, %arg0, %c0_i32 : i32, i32, i32
  }
  func.func @transform_3(%arg0: i32, %arg1: i32) -> (i32, i32) {
    %c0_i32 = arith.constant 0 : i32
    %c0_i32_0 = arith.constant 0 : i32
    %c0_i32_1 = arith.constant 0 : i32
    return %c0_i32, %c0_i32_0 : i32, i32
  }
  func.func @transform_4(%arg0: i32, %arg1: i32) -> (i32, i32) {
    %c0_i32 = arith.constant 0 : i32
    %c0_i32_0 = arith.constant 0 : i32
    %c0_i32_1 = arith.constant 0 : i32
    return %c0_i32, %c0_i32_0 : i32, i32
  }
  func.func @transform_5(%arg0: i32, %arg1: i32) -> (i32, i32) {
    %c0_i32 = arith.constant 0 : i32
    %c0_i32_0 = arith.constant 0 : i32
    %c0_i32_1 = arith.constant 0 : i32
    return %c0_i32, %c0_i32_0 : i32, i32
  }
  func.func @transform_6(%arg0: i32, %arg1: i32) -> i32 {
    %c0_i32 = arith.constant 0 : i32
    %c0_i32_0 = arith.constant 0 : i32
    return %c0_i32 : i32
  }
  func.func @transform_7(%arg0: i32, %arg1: i32) -> (i32, i32, i32) {
    %c0_i32 = arith.constant 0 : i32
    %c0_i32_0 = arith.constant 0 : i32
    %c0_i32_1 = arith.constant 0 : i32
    return %arg0, %c0_i32, %c0_i32_0 : i32, i32, i32
  }
}

module attributes {stable_mosaic.version = 11 : i64} {
  func.func @output_kernel(%arg0: i32, %arg1: memref<2x128xf32, #tpu.memory_space<vmem>>, %arg2: memref<2x8x128xf32, #tpu.memory_space<vmem>>, %arg3: memref<128x128xbf16, #tpu.memory_space<vmem>>, %arg4: memref<1x128xf32, #tpu.memory_space<vmem>>, %arg5: memref<128x128xbf16, #tpu.memory_space<vmem>>, %arg6: memref<1x128xf32, #tpu.memory_space<vmem>>, %arg7: memref<1xf32, #tpu.memory_space<smem>>, %arg8: memref<2x128xf32, #tpu.memory_space<vmem>>, %arg9: memref<2x128xf32, #tpu.memory_space<vmem>>) attributes {dimension_semantics = [#tpu.dimension_semantics<arbitrary>], iteration_bounds = array<i64: 1>, scalar_prefetch = 0 : i64, scratch_operands = 1 : i64, tpu.core_type = #tpu.core_type<tc>, window_params = [{pipeline_mode = #tpu.pipeline_mode<synchronous>, transform_indices = @transform_0, window_bounds = array<i64: 2, 128>}, {pipeline_mode = #tpu.pipeline_mode<synchronous>, transform_indices = @transform_1, window_bounds = array<i64: 2, 8, 128>}, {pipeline_mode = #tpu.pipeline_mode<synchronous>, transform_indices = @transform_2, window_bounds = array<i64: 128, 128>}, {pipeline_mode = #tpu.pipeline_mode<synchronous>, transform_indices = @transform_3, window_bounds = array<i64: 1, 128>}, {transform_indices = @transform_4, window_bounds = array<i64: 128, 128>}, {transform_indices = @transform_5, window_bounds = array<i64: 1, 128>}, {transform_indices = @transform_6, window_bounds = array<i64: 1>}, {transform_indices = @transform_7, window_bounds = array<i64: 2, 128>}]} {
    %c0_i32 = arith.constant 0 : i32
    %0 = arith.cmpi eq, %arg0, %c0_i32 : i32
    %1 = arith.extui %0 : i1 to i32
    %c0_i32_0 = arith.constant 0 : i32
    %2 = arith.cmpi ne, %1, %c0_i32_0 : i32
    scf.if %2 {
      %c0_8 = arith.constant 0 : index
      %c0_9 = arith.constant 0 : index
      %13 = vector.load %arg1[%c0_8, %c0_9] : memref<2x128xf32, #tpu.memory_space<vmem>>, vector<2x128xf32>
      %c0_10 = arith.constant 0 : index
      %c0_11 = arith.constant 0 : index
      %c0_12 = arith.constant 0 : index
      %14 = vector.load %arg2[%c0_10, %c0_11, %c0_12] : memref<2x8x128xf32, #tpu.memory_space<vmem>>, vector<2x8x128xf32>
      %c0_13 = arith.constant 0 : index
      %15 = memref.load %arg7[%c0_13] : memref<1xf32, #tpu.memory_space<smem>>
      %16 = vector.shape_cast %13 : vector<2x128xf32> to vector<2x1x128xf32>
      %17 = vector.broadcast %16 : vector<2x1x128xf32> to vector<2x8x128xf32>
      %18 = arith.mulf %14, %17 : vector<2x8x128xf32>
      %cst_14 = arith.constant dense<0.000000e+00> : vector<2x8xf32>
      %19 = vector.multi_reduction <add>, %18, %cst_14 [2] : vector<2x8x128xf32> to vector<2x8xf32>
      %20 = tpu.iota {dimensions = array<i32: 1>} : vector<2x8xi32>
      %c8_i32 = arith.constant 8 : i32
      %21 = vector.broadcast %c8_i32 : i32 to vector<2x8xi32>
      %22 = arith.cmpi slt, %20, %21 : vector<2x8xi32>
      %cst_15 = arith.constant -1.000000e+30 : f32
      %23 = vector.broadcast %cst_15 : f32 to vector<2x8xf32>
      %24 = arith.select %22, %19, %23 : vector<2x8xi1>, vector<2x8xf32>
      %cst_16 = arith.constant dense<0xFF800000> : vector<2xf32>
      %25 = vector.multi_reduction <maximumf>, %24, %cst_16 [1] : vector<2x8xf32> to vector<2xf32>
      %26 = vector.shape_cast %25 : vector<2xf32> to vector<2x1xf32>
      %27 = vector.broadcast %26 : vector<2x1xf32> to vector<2x8xf32>
      %28 = arith.subf %24, %27 : vector<2x8xf32>
      %29 = math.exp %28 : vector<2x8xf32>
      %cst_17 = arith.constant dense<0.000000e+00> : vector<2xf32>
      %30 = vector.multi_reduction <add>, %29, %cst_17 [1] : vector<2x8xf32> to vector<2xf32>
      %31 = vector.shape_cast %30 : vector<2xf32> to vector<2x1xf32>
      %32 = vector.broadcast %31 : vector<2x1xf32> to vector<2x8xf32>
      %33 = arith.divf %29, %32 : vector<2x8xf32>
      %34 = vector.shape_cast %33 : vector<2x8xf32> to vector<2x8x1xf32>
      %35 = vector.broadcast %34 : vector<2x8x1xf32> to vector<2x8x128xf32>
      %36 = arith.mulf %35, %14 : vector<2x8x128xf32>
      %cst_18 = arith.constant dense<0.000000e+00> : vector<2x128xf32>
      %37 = vector.multi_reduction <add>, %36, %cst_18 [1] : vector<2x8x128xf32> to vector<2x128xf32>
      %38 = arith.truncf %37 : vector<2x128xf32> to vector<2x128xbf16>
      %c0_19 = arith.constant 0 : index
      %c0_20 = arith.constant 0 : index
      %39 = vector.load %arg3[%c0_19, %c0_20] : memref<128x128xbf16, #tpu.memory_space<vmem>>, vector<128x128xbf16>
      %cst_21 = arith.constant dense<0.000000e+00> : vector<2x128xf32>
      %40 = tpu.matmul %38, %39, %cst_21 {dimension_numbers = #tpu.dot_dimension_numbers<[1], [0], [0], [1], [0, 0, 1, 1], [], []>} : vector<2x128xbf16>, vector<128x128xbf16>, vector<2x128xf32> -> vector<2x128xf32>
      %41 = arith.addf %13, %40 : vector<2x128xf32>
      %c0_22 = arith.constant 0 : index
      %c0_23 = arith.constant 0 : index
      %42 = vector.load %arg4[%c0_22, %c0_23] : memref<1x128xf32, #tpu.memory_space<vmem>>, vector<1x128xf32>
      %43 = vector.shape_cast %42 : vector<1x128xf32> to vector<128xf32>
      %44 = vector.shape_cast %43 : vector<128xf32> to vector<1x128xf32>
      %45 = vector.broadcast %44 : vector<1x128xf32> to vector<2x128xf32>
      %46 = arith.addf %41, %45 : vector<2x128xf32>
      %cst_24 = arith.constant 0.000000e+00 : f32
      %47 = vector.broadcast %cst_24 : f32 to vector<2x128xf32>
      %48 = arith.cmpf oge, %46, %47 : vector<2x128xf32>
      %49 = vector.broadcast %15 : f32 to vector<2x128xf32>
      %50 = arith.mulf %49, %46 : vector<2x128xf32>
      %51 = arith.select %48, %46, %50 : vector<2x128xi1>, vector<2x128xf32>
      %c0_25 = arith.constant 0 : index
      %c0_26 = arith.constant 0 : index
      %52 = vector.load %arg9[%c0_25, %c0_26] : memref<2x128xf32, #tpu.memory_space<vmem>>, vector<2x128xf32>
      tpu.vector_store %arg9[%c0_25, %c0_26], %51 {strides = array<i32>} : memref<2x128xf32, #tpu.memory_space<vmem>>, vector<2x128xf32>,
    } else {
    }
    %c0 = arith.constant 0 : index
    %c0_1 = arith.constant 0 : index
    %3 = vector.load %arg9[%c0, %c0_1] : memref<2x128xf32, #tpu.memory_space<vmem>>, vector<2x128xf32>
    %4 = arith.truncf %3 : vector<2x128xf32> to vector<2x128xbf16>
    %c0_2 = arith.constant 0 : index
    %c0_3 = arith.constant 0 : index
    %5 = vector.load %arg5[%c0_2, %c0_3] : memref<128x128xbf16, #tpu.memory_space<vmem>>, vector<128x128xbf16>
    %cst = arith.constant dense<0.000000e+00> : vector<2x128xf32>
    %6 = tpu.matmul %4, %5, %cst {dimension_numbers = #tpu.dot_dimension_numbers<[1], [0], [0], [1], [0, 0, 1, 1], [], []>} : vector<2x128xbf16>, vector<128x128xbf16>, vector<2x128xf32> -> vector<2x128xf32>
    %c0_4 = arith.constant 0 : index
    %c0_5 = arith.constant 0 : index
    %7 = vector.load %arg6[%c0_4, %c0_5] : memref<1x128xf32, #tpu.memory_space<vmem>>, vector<1x128xf32>
    %8 = vector.shape_cast %7 : vector<1x128xf32> to vector<128xf32>
    %9 = vector.shape_cast %8 : vector<128xf32> to vector<1x128xf32>
    %10 = vector.broadcast %9 : vector<1x128xf32> to vector<2x128xf32>
    %11 = arith.addf %6, %10 : vector<2x128xf32>
    %c0_6 = arith.constant 0 : index
    %c0_7 = arith.constant 0 : index
    %12 = vector.load %arg8[%c0_6, %c0_7] : memref<2x128xf32, #tpu.memory_space<vmem>>, vector<2x128xf32>
    tpu.vector_store %arg8[%c0_6, %c0_7], %11 {strides = array<i32>} : memref<2x128xf32, #tpu.memory_space<vmem>>, vector<2x128xf32>,
    return
  }
  func.func @transform_0(%arg0: i32) -> (i32, i32) {
    %c0_i32 = arith.constant 0 : i32
    %c0_i32_0 = arith.constant 0 : i32
    %c0_i32_1 = arith.constant 0 : i32
    return %c0_i32, %c0_i32_0 : i32, i32
  }
  func.func @transform_1(%arg0: i32) -> (i32, i32, i32) {
    %c0_i32 = arith.constant 0 : i32
    %c0_i32_0 = arith.constant 0 : i32
    %c0_i32_1 = arith.constant 0 : i32
    %c0_i32_2 = arith.constant 0 : i32
    return %c0_i32, %c0_i32_0, %c0_i32_1 : i32, i32, i32
  }
  func.func @transform_2(%arg0: i32) -> (i32, i32) {
    %c0_i32 = arith.constant 0 : i32
    %c0_i32_0 = arith.constant 0 : i32
    %c0_i32_1 = arith.constant 0 : i32
    return %c0_i32, %c0_i32_0 : i32, i32
  }
  func.func @transform_3(%arg0: i32) -> (i32, i32) {
    %c0_i32 = arith.constant 0 : i32
    %c0_i32_0 = arith.constant 0 : i32
    %c0_i32_1 = arith.constant 0 : i32
    return %c0_i32, %c0_i32_0 : i32, i32
  }
  func.func @transform_4(%arg0: i32) -> (i32, i32) {
    %c0_i32 = arith.constant 0 : i32
    %c0_i32_0 = arith.constant 0 : i32
    return %c0_i32, %arg0 : i32, i32
  }
  func.func @transform_5(%arg0: i32) -> (i32, i32) {
    %c0_i32 = arith.constant 0 : i32
    %c0_i32_0 = arith.constant 0 : i32
    return %c0_i32, %arg0 : i32, i32
  }
  func.func @transform_6(%arg0: i32) -> i32 {
    %c0_i32 = arith.constant 0 : i32
    %c0_i32_0 = arith.constant 0 : i32
    return %c0_i32 : i32
  }
  func.func @transform_7(%arg0: i32) -> (i32, i32) {
    %c0_i32 = arith.constant 0 : i32
    %c0_i32_0 = arith.constant 0 : i32
    return %c0_i32, %arg0 : i32, i32
  }
}

</mosaic_0001>

<bundles_post_ra>
// kernel: entnet_forward.5
= control target key start
LH: loop header
LB: loop body
LE: loop exit
PB: predicated region body
PF: predicated region fallthrough
CT: control target
= control target key end

     0   :  { %vm44_vm0 = vcmask 1045504   ;;  %vm173_vm1 = vcmask 1041409   ;;  %vm175_vm2 = vcmask 1042434   ;;  %vm177_vm3 = vcmask 1043459   ;;  %s346_s0 = inlined_call_operand.vmem [shape: f32[16,6,128], index: 0, kind: input, shape index: {}]   ;;  %s347_s1 = inlined_call_operand.vmem [shape: f32[6,128], index: 1, kind: input, shape index: {}]   ;;  %s348_s2 = inlined_call_operand.vmem [shape: f32[16,128], index: 2, kind: output, shape index: {}]  }
   0x1   :  { %v11_v0 = vld [vmem:[%s346_s0] sm:$0x3f]  ;;  %v12_v1 = vld [vmem:[%s346_s0 + $0x8] sm:$0x3f]  ;;  %v13_v2 = vld [vmem:[%s346_s0 + $0x10] sm:$0x3f] }
   0x2   :  { %v14_v3 = vld [vmem:[%s346_s0 + $0x18] sm:$0x3f]  ;;  %v15_v4 = vld [vmem:[%s346_s0 + $0x20] sm:$0x3f]  ;;  %v16_v5 = vld [vmem:[%s346_s0 + $0x28] sm:$0x3f] }
   0x3   :  { %v17_v6 = vld [vmem:[%s346_s0 + $0x30] sm:$0x3f]  ;;  %v18_v7 = vld [vmem:[%s346_s0 + $0x38] sm:$0x3f]  ;;  %v19_v8 = vld [vmem:[%s346_s0 + $0x40] sm:$0x3f] }
   0x4   :  { %v247_v9 = vld [vmem:[%s347_s1] sm:$0x3f]  ;;  %v20_v10 = vld [vmem:[%s346_s0 + $0x48] sm:$0x3f]  ;;  %v21_v11 = vld [vmem:[%s346_s0 + $0x50] sm:$0x3f] }
   0x5   :  { %v22_v12 = vld [vmem:[%s346_s0 + $0x58] sm:$0x3f]  ;;  %v28_v13 = vmul.f32 %v247_v9, %v11_v0  ;;  %v29_v14 = vmul.f32 %v247_v9, %v12_v1  ;;  %v30_v15 = vmul.f32 %v247_v9, %v13_v2  ;;  %v31_v16 = vmul.f32 %v247_v9, %v14_v3  ;;  %v23_v53 = vld [vmem:[%s346_s0 + $0x60] sm:$0x3f]  ;;  %v24_v54 = vld [vmem:[%s346_s0 + $0x68] sm:$0x3f] }
   0x6   :  { %v32_v17 = vmul.f32 %v247_v9, %v15_v4  ;;  %v33_v18 = vmul.f32 %v247_v9, %v16_v5  ;;  %v34_v19 = vmul.f32 %v247_v9, %v17_v6  ;;  %v35_v20 = vmul.f32 %v247_v9, %v18_v7  ;;  %v25_v55 = vld [vmem:[%s346_s0 + $0x70] sm:$0x3f]  ;;  %v26_v60 = vld [vmem:[%s346_s0 + $0x78] sm:$0x3f] }
   0x7   :  { %v36_v21 = vmul.f32 %v247_v9, %v19_v8  ;;  %v37_v22 = vmul.f32 %v247_v9, %v20_v10  ;;  %v38_v23 = vmul.f32 %v247_v9, %v21_v11  ;;  %v39_v24 = vmul.f32 %v247_v9, %v22_v12 }
   0x8   :  { %v45_v25 = vsel %vm44_vm0, %v28_v13, 0.0  ;;  %v52_v26 = vsel %vm44_vm0, %v29_v14, 0.0  ;;  %v59_v27 = vsel %vm44_vm0, %v30_v15, 0.0  ;;  %v66_v28 = vsel %vm44_vm0, %v31_v16, 0.0 }
   0x9   :  { %v46_v29 = vrot.slane %v45_v25, 4  ;;  %v53_v30 = vrot.slane %v52_v26, 4  ;;  %v60_v31 = vrot.slane %v59_v27, 4  ;;  %v67_v32 = vrot.slane %v66_v28, 4 }
   0xa   :  { %v73_v33 = vsel %vm44_vm0, %v32_v17, 0.0  ;;  %v80_v34 = vsel %vm44_vm0, %v33_v18, 0.0  ;;  %v87_v35 = vsel %vm44_vm0, %v34_v19, 0.0  ;;  %v94_v36 = vsel %vm44_vm0, %v35_v20, 0.0 }
   0xb   :  { %v47_v37 = vadd.f32 %v46_v29, %v45_v25  ;;  %v54_v38 = vadd.f32 %v53_v30, %v52_v26  ;;  %v61_v39 = vadd.f32 %v60_v31, %v59_v27  ;;  %v68_v40 = vadd.f32 %v67_v32, %v66_v28 }
   0xc   :  { %v74_v41 = vrot.slane %v73_v33, 4  ;;  %v81_v42 = vrot.slane %v80_v34, 4  ;;  %v88_v43 = vrot.slane %v87_v35, 4  ;;  %v95_v44 = vrot.slane %v94_v36, 4 }
   0xd   :  { %v48_v45 = vrot.slane %v47_v37, 2  ;;  %v55_v46 = vrot.slane %v54_v38, 2  ;;  %v62_v47 = vrot.slane %v61_v39, 2  ;;  %v69_v48 = vrot.slane %v68_v40, 2 }
   0xe   :  { %v75_v49 = vadd.f32 %v74_v41, %v73_v33  ;;  %v82_v50 = vadd.f32 %v81_v42, %v80_v34  ;;  %v89_v51 = vadd.f32 %v88_v43, %v87_v35  ;;  %v96_v52 = vadd.f32 %v95_v44, %v94_v36 }
   0xf   :  { %v49_v56 = vadd.f32 %v48_v45, %v47_v37  ;;  %v56_v57 = vadd.f32 %v55_v46, %v54_v38  ;;  %v63_v58 = vadd.f32 %v62_v47, %v61_v39  ;;  %v70_v59 = vadd.f32 %v69_v48, %v68_v40 }
  0x10   :  { %v76_v61 = vrot.slane %v75_v49, 2  ;;  %v83_v62 = vrot.slane %v82_v50, 2  ;;  %v90_v63 = vrot.slane %v89_v51, 2  ;;  %v97_v0 = vrot.slane %v96_v52, 2 }
  0x11   :  { %v50_v1 = vrot.slane %v49_v56, 1  ;;  %v57_v2 = vrot.slane %v56_v57, 1  ;;  %v64_v3 = vrot.slane %v63_v58, 1  ;;  %v71_v4 = vrot.slane %v70_v59, 1 }
  0x12   :  { %v290_v5 = vadd.f32 %v76_v61, %v75_v49  ;;  %v292_v6 = vadd.f32 %v83_v62, %v82_v50  ;;  %v294_v7 = vadd.f32 %v90_v63, %v89_v51  ;;  %v296_v8 = vadd.f32 %v97_v0, %v96_v52 }
  0x13   :  { %v40_v10 = vmul.f32 %v247_v9, %v23_v53  ;;  %v41_v11 = vmul.f32 %v247_v9, %v24_v54  ;;  %v42_v12 = vmul.f32 %v247_v9, %v25_v55  ;;  %v43_v13 = vmul.f32 %v247_v9, %v26_v60 }
  0x14   :  { %v302_v14 = vadd.f32 %v50_v1, %v49_v56  ;;  %v304_v15 = vadd.f32 %v57_v2, %v56_v57  ;;  %v306_v16 = vadd.f32 %v64_v3, %v63_v58  ;;  %v308_v17 = vadd.f32 %v71_v4, %v70_v59 }
  0x15   :  { %v101_v18 = vsel %vm44_vm0, %v36_v21, 0.0  ;;  %v108_v19 = vsel %vm44_vm0, %v37_v22, 0.0  ;;  %v115_v20 = vsel %vm44_vm0, %v38_v23, 0.0  ;;  %v122_v25 = vsel %vm44_vm0, %v39_v24, 0.0 }
  0x16   :  { %v78_v26 = vrot.slane %v290_v5, 1  ;;  %v85_v9 = vrot.slane %v292_v6, 1  ;;  %v92_v27 = vrot.slane %v294_v7, 1  ;;  %v99_v28 = vrot.slane %v296_v8, 1 }
  0x17   :  { %v102_v29 = vrot.slane %v101_v18, 4  ;;  %v109_v30 = vrot.slane %v108_v19, 4  ;;  %v116_v31 = vrot.slane %v115_v20, 4  ;;  %v123_v32 = vrot.slane %v122_v25, 4 }
  0x18   :  { %v129_v21 = vsel %vm44_vm0, %v40_v10, 0.0  ;;  %v136_v22 = vsel %vm44_vm0, %v41_v11, 0.0  ;;  %v143_v23 = vsel %vm44_vm0, %v42_v12, 0.0  ;;  %v150_v24 = vsel %vm44_vm0, %v43_v13, 0.0 }
  0x19   :  { %v103_v33 = vadd.f32 %v102_v29, %v101_v18  ;;  %v110_v34 = vadd.f32 %v109_v30, %v108_v19  ;;  %v117_v35 = vadd.f32 %v116_v31, %v115_v20  ;;  %v124_v36 = vadd.f32 %v123_v32, %v122_v25 }
  0x1a   :  { %v130_v37 = vrot.slane %v129_v21, 4  ;;  %v137_v38 = vrot.slane %v136_v22, 4  ;;  %v144_v39 = vrot.slane %v143_v23, 4  ;;  %v151_v40 = vrot.slane %v150_v24, 4 }
  0x1b   :  { %v104_v41 = vrot.slane %v103_v33, 2  ;;  %v111_v42 = vrot.slane %v110_v34, 2  ;;  %v118_v43 = vrot.slane %v117_v35, 2  ;;  %v125_v44 = vrot.slane %v124_v36, 2 }
  0x1c   :  { %v131_v45 = vadd.f32 %v130_v37, %v129_v21  ;;  %v138_v46 = vadd.f32 %v137_v38, %v136_v22  ;;  %v145_v47 = vadd.f32 %v144_v39, %v143_v23  ;;  %v152_v48 = vadd.f32 %v151_v40, %v150_v24 }
  0x1d   :  { %vm179_vm4 = vcmask 1044484   ;;  %v105_v49 = vadd.f32 %v104_v41, %v103_v33  ;;  %v112_v50 = vadd.f32 %v111_v42, %v110_v34  ;;  %v119_v51 = vadd.f32 %v118_v43, %v117_v35 }
  0x1e   :  { %v126_v52 = vadd.f32 %v125_v44, %v124_v36  ;;  %v132_v53 = vrot.slane %v131_v45, 2  ;;  %v139_v54 = vrot.slane %v138_v46, 2  ;;  %v146_v55 = vrot.slane %v145_v47, 2 }
  0x1f   :  { %v153_v56 = vrot.slane %v152_v48, 2  ;;  %v106_v57 = vrot.slane %v105_v49, 1  ;;  %v113_v58 = vrot.slane %v112_v50, 1  ;;  %v120_v59 = vrot.slane %v119_v51, 1 }
  0x20   :  { %v127_v60 = vrot.slane %v126_v52, 1  ;;  %v133_v61 = vadd.f32 %v132_v53, %v131_v45  ;;  %v140_v62 = vadd.f32 %v139_v54, %v138_v46  ;;  %v147_v63 = vadd.f32 %v146_v55, %v145_v47 }
  0x21   :  { %v154_v0 = vadd.f32 %v153_v56, %v152_v48  ;;  %v107_v1 = vadd.f32 %v106_v57, %v105_v49  ;;  %v114_v2 = vadd.f32 %v113_v58, %v112_v50  ;;  %v121_v3 = vadd.f32 %v120_v59, %v119_v51 }
  0x22   :  { %v128_v4 = vadd.f32 %v127_v60, %v126_v52  ;;  %v134_v10 = vrot.slane %v133_v61, 1  ;;  %v141_v11 = vrot.slane %v140_v62, 1  ;;  %v148_v12 = vrot.slane %v147_v63, 1 }
  0x23   :  { %v155_v13 = vrot.slane %v154_v0, 1  ;;  %v79_v18 = vadd.f32 %v78_v26, %v290_v5  ;;  %v174_v19 = vsel %vm173_vm1, %v304_v15, %v302_v14  ;;  %vm181_vm5 = vcmask 1045509  }
  0x24   :  { %v187_v20 = vsel %vm173_vm1, %v114_v2, %v107_v1  ;;  %v86_v25 = vadd.f32 %v85_v9, %v292_v6  ;;  %v93_v29 = vadd.f32 %v92_v27, %v294_v7  ;;  %v135_v30 = vadd.f32 %v134_v10, %v133_v61 }
  0x25   :  { %v142_v31 = vadd.f32 %v141_v11, %v140_v62  ;;  %v100_v32 = vadd.f32 %v99_v28, %v296_v8  ;;  %v149_v21 = vadd.f32 %v148_v12, %v147_v63  ;;  %v176_v22 = vsel %vm175_vm2, %v306_v16, %v174_v19 }
  0x26   :  { %v188_v5 = vsel %vm175_vm2, %v121_v3, %v187_v20  ;;  %v156_v26 = vadd.f32 %v155_v13, %v154_v0  ;;  %v178_v14 = vsel %vm177_vm3, %v308_v17, %v176_v22  ;;  %vm183_vm6 = vcmask 1046534  }
  0x27   :  { %v189_v15 = vsel %vm177_vm3, %v128_v4, %v188_v5  ;;  %v180_v6 = vsel %vm179_vm4, %v79_v18, %v178_v14  ;;  %vm185_vm7 = vcmask 1047559  }
  0x28   :  { %v190_v7 = vsel %vm179_vm4, %v135_v30, %v189_v15  ;;  %v182_v8 = vsel %vm181_vm5, %v86_v25, %v180_v6 }
  0x29   :  { %v191_v9 = vsel %vm181_vm5, %v142_v31, %v190_v7  ;;  %v184_v27 = vsel %vm183_vm6, %v93_v29, %v182_v8 }
  0x2a   :  { %v192_v16 = vsel %vm183_vm6, %v149_v21, %v191_v9  ;;  %v186_v28 = vsel %vm185_vm7, %v100_v32, %v184_v27 }
  0x2b   :  { %v193_v23 = vsel %vm185_vm7, %v156_v26, %v192_v16  ;;  %196 = vst [vmem:[%s348_s2] sm:$0xff] %v186_v28 }
  0x2c   :  { %197 = vst [vmem:[%s348_s2 + $0x8] sm:$0xff] %v193_v23 }

// kernel: entnet_forward.6
= control target key start
LH: loop header
LB: loop body
LE: loop exit
PB: predicated region body
PF: predicated region fallthrough
CT: control target
= control target key end

     0   :  { %vm16_vm0 = vcmask 1045504   ;;  %vm33_vm1 = vcmask 1041409   ;;  %s68_s0 = inlined_call_operand.vmem [shape: f32[2,6,128], index: 0, kind: input, shape index: {}]   ;;  %s69_s1 = inlined_call_operand.vmem [shape: f32[6,128], index: 1, kind: input, shape index: {}]   ;;  %s70_s2 = inlined_call_operand.vmem [shape: f32[2,128], index: 2, kind: output, shape index: {}]  }
   0x1   :  { %v11_v0 = vld [vmem:[%s68_s0] sm:$0x3f]  ;;  %v12_v1 = vld [vmem:[%s68_s0 + $0x8] sm:$0x3f] }
   0x2   :  { %v13_v2 = vld [vmem:[%s69_s1] sm:$0x3f] }
   0x3   :  { %v14_v3 = vmul.f32 %v13_v2, %v11_v0  ;;  %v15_v4 = vmul.f32 %v13_v2, %v12_v1 }
   0x5   :  { %v17_v5 = vsel %vm16_vm0, %v14_v3, 0.0  ;;  %v24_v6 = vsel %vm16_vm0, %v15_v4, 0.0 }
   0x6   :  { %v18_v7 = vrot.slane %v17_v5, 4  ;;  %v25_v8 = vrot.slane %v24_v6, 4 }
   0x8   :  { %v19_v9 = vadd.f32 %v18_v7, %v17_v5  ;;  %v26_v10 = vadd.f32 %v25_v8, %v24_v6 }
   0xa   :  { %v20_v11 = vrot.slane %v19_v9, 2  ;;  %v27_v12 = vrot.slane %v26_v10, 2 }
   0xc   :  { %v21_v13 = vadd.f32 %v20_v11, %v19_v9  ;;  %v28_v14 = vadd.f32 %v27_v12, %v26_v10 }
   0xe   :  { %v22_v15 = vrot.slane %v21_v13, 1  ;;  %v29_v16 = vrot.slane %v28_v14, 1 }
  0x10   :  { %v23_v17 = vadd.f32 %v22_v15, %v21_v13  ;;  %v30_v18 = vadd.f32 %v29_v16, %v28_v14 }
  0x12   :  { %v34_v19 = vsel %vm33_vm1, %v30_v18, %v23_v17 }
  0x13   :  { %36 = vst [vmem:[%s70_s2] sm:$0x3] %v34_v19 }

// kernel: entnet_forward.7
= control target key start
LH: loop header
LB: loop body
LE: loop exit
PB: predicated region body
PF: predicated region fallthrough
CT: control target
= control target key end

     0   :  { %v236_v0 = vmov 0.0   ;;  %vm237_vm0 = vmmov 0   ;;  %vm170_vm1 = vcmask 64512   ;;  %s308_s2 = inlined_call_operand.vmem [shape: bf16[128,128], index: 2, kind: input, shape index: {}]   ;;  %s309_s1 = inlined_call_operand.vmem [shape: f32[8,128], index: 1, kind: input, shape index: {}]   ;;  %s310_s0 = inlined_call_operand.vmem [shape: f32[16,128], index: 0, kind: input, shape index: {}]   ;;  %s311_s4 = inlined_call_operand.vmem [shape: f32[16,8], index: 4, kind: output, shape index: {1}]   ;;  %s312_s3 = inlined_call_operand.vmem [shape: f32[16,128], index: 3, kind: output, shape index: {0}]  }
   0x1   :  { %200 = vmatprep.subr.bf16.mxu0 %v236_v0  ;;  %v228_v1 = vld [vmem:[%s308_s2] sm:$0xff]   ;;  %220 = vmatprep.subr.bf16.mxu1 %v236_v0  ;;  %v229_v2 = vld [vmem:[%s308_s2 + $0x8] sm:$0xff]   ;;  %v230_v3 = vld [vmem:[%s308_s2 + $0x10] sm:$0xff]  }
   0x2   :  { %222 = vmatprep.mubr.msk.bf16.mxu1 %vm237_vm0, %v236_v0  ;;  %216 = vmatprep.mubr.msk.bf16.mxu0 %vm237_vm0, %v236_v0  ;;  %v20_v4 = vld [vmem:[%s309_s1] sm:$0xff]  ;;  %v18_v7 = vld [vmem:[%s310_s0 + $0x8] sm:$0xff]  ;;  %v231_v8 = vld [vmem:[%s308_s2 + $0x18] sm:$0xff]  }
   0x3   :  { %201 = vmatpush3.bf16.msra.mxu0 %v228_v1  ;;  %v21_v5 = vpack.c.bf16 %v20_v4, %v20_v4  ;;  %v17_v6 = vld [vmem:[%s310_s0] sm:$0xff]  ;;  %v233_v11 = vld [vmem:[%s308_s2 + $0x28] sm:$0xff]   ;;  %v234_v12 = vld [vmem:[%s308_s2 + $0x30] sm:$0xff]  }
   0x4   :  { %202 = vmatprep.subr.bf16.mxu0 %v236_v0  ;;  %v19_v9 = vpack.c.bf16 %v18_v7, %v17_v6  ;;  %v232_v10 = vld [vmem:[%s308_s2 + $0x20] sm:$0xff]   ;;  %v235_v13 = vld [vmem:[%s308_s2 + $0x38] sm:$0xff]  }
   0x5   :  { %221 = vmatpush3.bf16.xpose.msra.mxu1 %v21_v5 }
   0x7   :  { %203 = vmatpush3.bf16.msra.mxu0 %v229_v2 }
   0x8   :  { %204 = vmatprep.subr.bf16.mxu0 %v236_v0 }
   0xb   :  { %205 = vmatpush3.bf16.msra.mxu0 %v230_v3 }
   0xc   :  { %206 = vmatprep.subr.bf16.mxu0 %v236_v0  ;;  %223 = vmatmul.mubr.bf16.vlgmr.msra.gmra.mrb[0].mxu1 %v19_v9 }
   0xf   :  { %207 = vmatpush3.bf16.msra.mxu0 %v231_v8 }
  0x10   :  { %208 = vmatprep.subr.bf16.mxu0 %v236_v0 }
  0x13   :  { %209 = vmatpush3.bf16.msra.mxu0 %v232_v10 }
  0x14   :  { %210 = vmatprep.subr.bf16.mxu0 %v236_v0 }
  0x17   :  { %211 = vmatpush3.bf16.msra.mxu0 %v233_v11 }
  0x18   :  { %212 = vmatprep.subr.bf16.mxu0 %v236_v0 }
  0x1b   :  { %213 = vmatpush3.bf16.msra.mxu0 %v234_v12 }
  0x1c   :  { %214 = vmatprep.subr.bf16.mxu0 %v236_v0 }
  0x1f   :  { %215 = vmatpush3.bf16.msra.mxu0 %v235_v13 }
  0x22   :  { %217 = vmatmul.mubr.bf16.vlgmr.msra.gmra.mrb[0].mxu0 %v19_v9 }
  0xdf   :  { %v163_v14 = vpop.f32.mrb[0].mxu1 }
  0xe0   :  { %171 = vst.msk [vmem:[%s311_s4] sm:$0xff] %vm170_vm1, %v163_v14  ;;  %v224_v15 = vpop.f32.mrb[1].mxu1 }
  0xe1   :  { %v166_v16 = vpop.f32.mrb[2].mxu1 }
  0xe2   :  { %172 = vst.msk [vmem:[%s311_s4 + $0x8] sm:$0xff] %vm170_vm1, %v166_v16  ;;  %v225_v17 = vpop.f32.mrb[3].mxu1 }
  0xf5   :  { %v120_v18 = vpop.f32.mrb[0].mxu0 }
  0xf6   :  { %127 = vst [vmem:[%s312_s3] sm:$0xff] %v120_v18  ;;  %v218_v19 = vpop.f32.mrb[1].mxu0 }
  0xf7   :  { %v123_v20 = vpop.f32.mrb[2].mxu0 }
  0xf8   :  { %128 = vst [vmem:[%s312_s3 + $0x8] sm:$0xff] %v123_v20  ;;  %v219_v21 = vpop.f32.mrb[3].mxu0 }

// kernel: entnet_forward.8
= control target key start
LH: loop header
LB: loop body
LE: loop exit
PB: predicated region body
PF: predicated region fallthrough
CT: control target
= control target key end

     0   :  { %s1054_s26 = smov 0   ;;  %s1056_s27 = smov 0   ;;  %s1196_s0 = inlined_call_operand.vmem [shape: f32[8,2,128], index: 0, kind: input, shape index: {}]   ;;  %s1197_s1 = inlined_call_operand.vmem [shape: f32[8,2,128], index: 1, kind: input, shape index: {}]   ;;  %s1198_s2 = inlined_call_operand.vmem [shape: f32[8,2,8], index: 2, kind: input, shape index: {}]   ;;  %s1199_s3 = inlined_call_operand.vmem [shape: f32[8,128], index: 3, kind: input, shape index: {}]   ;;  %s1200_s4 = inlined_call_operand.vmem [shape: bf16[128,128], index: 4, kind: input, shape index: {}]   ;;  %s1201_s5 = inlined_call_operand.vmem [shape: bf16[128,128], index: 5, kind: input, shape index: {}]   ;;  %s1202_s6 = inlined_call_operand.<no memory space> [shape: f32[1], index: 6, kind: input, shape index: {}]   ;;  %s1203_s7 = inlined_call_operand.vmem [shape: f32[2,8,128], index: 7, kind: output, shape index: {}]  }
   0x1   :  { %12 = sst [smem:[#allocation4]] %s1202_s6  ;;  %s1058_s28 = smov 0  }
   0x2 LB: > { %s27_s6 = sadd.s32 1, %s999_s27  ;;  %p833_p0 = scmp.ge.s32.totalorder %s1003_s28, 1  ;;  %s1003_s28 = sphi %s1058_s28, %s18_s28   ;;  %s999_s27 = sphi %s1056_s27, %s1205_s27   ;;  %s995_s26 = sphi %s1054_s26, %s1204_s26  }
   0x3   : > { %p28_p1 = scmp.ge.s32.totalorder %s27_s6, 8  ;;  %p282_p2 = scmp.lt.s32.totalorder %s1003_s28, 9 }
   0x5   : > { %s1207_s6 = smov (%p28_p1, %s27_s6), 0  ;;  %p283_p3 = pnand %p833_p0, %p282_p2 }
   0x6   : > { %p330_p4 = scmp.lt.s32.totalorder (!%p283_p3), %s995_s26, 7  ;;  %p837_p5 = scmp.ne.s32.totalorder (!%p283_p3), %s995_s26, 0 }
   0x7   : > { %286 = sbr.rel (%p283_p3) target bundleno = 750 (0x2ee), region = 48 }
   0xe   : > { %s331_s29 = scalar_select %p330_p4, %s995_s26, 7 }
   0xf   : > { %361 = sbr.rel (%p837_p5) target bundleno = 263 (0x107), region = 52  ;;  %v362_v0 = vld [vmem:[%s1199_s3] sm:$0xff] (!%p837_p5)  ;;  %v1005_v1 = vmov (!%p837_p5), 0.0   ;;  %vm1006_vm0 = vmmov (!%p837_p5), 0   ;;  %v952_v3 = vld [vmem:[%s1201_s5 + $0x8] sm:$0xff] (!%p837_p5)   ;;  %v953_v4 = vld [vmem:[%s1201_s5 + $0x10] sm:$0xff] (!%p837_p5)  }
  0x10   : > { %s1076_s30 = sshll.u32 %s331_s29, 1  ;;  %363 = vst [vmem:[#allocation2] sm:$0xff] (!%p837_p5), %v362_v0  ;;  %364 = vst [vmem:[#allocation2 + $0x8] sm:$0xff] (!%p837_p5), %v362_v0  ;;  %881 = vmatprep.subr.bf16.mxu0 (!%p837_p5), %v1005_v1  ;;  %v951_v2 = vld [vmem:[%s1201_s5] sm:$0xff] (!%p837_p5)   ;;  %897 = vmatprep.mubr.msk.bf16.mxu0 (!%p837_p5), %vm1006_vm0, %v1005_v1  ;;  %v954_v5 = vld [vmem:[%s1201_s5 + $0x18] sm:$0xff] (!%p837_p5)   ;;  %v366_v10 = vpack.c.bf16 (!%p837_p5), %v362_v0, %v362_v0 }
  0x11   : > { %s336_s10 = scalar_lea.vmem %s1196_s0, %s1076_s30  ;;  %s343_s13 = scalar_lea.vmem %s1197_s1, %s1076_s30  ;;  %882 = vmatpush3.bf16.msra.mxu0 (!%p837_p5), %v951_v2  ;;  %v955_v6 = vld [vmem:[%s1201_s5 + $0x20] sm:$0xff] (!%p837_p5)   ;;  %v956_v7 = vld [vmem:[%s1201_s5 + $0x28] sm:$0xff] (!%p837_p5)   ;;  %v957_v8 = vld [vmem:[%s1201_s5 + $0x30] sm:$0xff] (!%p837_p5)  }
  0x12   : > { %s350_s16 = scalar_lea.vmem %s1198_s2, %s1076_s30  ;;  %883 = vmatprep.subr.bf16.mxu0 (!%p837_p5), %v1005_v1  ;;  %v958_v9 = vld [vmem:[%s1201_s5 + $0x38] sm:$0xff] (!%p837_p5)  }
  0x15   : > { %884 = vmatpush3.bf16.msra.mxu0 (!%p837_p5), %v952_v3 }
  0x16   : > { %885 = vmatprep.subr.bf16.mxu0 %v1005_v1 }
  0x19   : > { %886 = vmatpush3.bf16.msra.mxu0 %v953_v4 }
  0x1a   : > { %887 = vmatprep.subr.bf16.mxu0 %v1005_v1 }
  0x1d   : > { %888 = vmatpush3.bf16.msra.mxu0 %v954_v5 }
  0x1e   : > { %889 = vmatprep.subr.bf16.mxu0 %v1005_v1 }
  0x21   : > { %890 = vmatpush3.bf16.msra.mxu0 %v955_v6 }
  0x22   : > { %891 = vmatprep.subr.bf16.mxu0 %v1005_v1 }
  0x25   : > { %892 = vmatpush3.bf16.msra.mxu0 %v956_v7 }
  0x26   : > { %893 = vmatprep.subr.bf16.mxu0 %v1005_v1 }
  0x29   : > { %894 = vmatpush3.bf16.msra.mxu0 %v957_v8 }
  0x2a   : > { %895 = vmatprep.subr.bf16.mxu0 %v1005_v1 }
  0x2d   : > { %896 = vmatpush3.bf16.msra.mxu0 %v958_v9 }
  0x30   : > { %898 = vmatmul.mubr.bf16.vlgmr.msra.gmra.mrb[0].mxu0 %v366_v10 }
 0x103   : > { %v465_v11 = vpop.f32.mrb[0].mxu0 }
 0x104   : > { %471 = vst [vmem:[#allocation3] sm:$0xff] %v465_v11  ;;  %v899_v12 = vpop.f32.mrb[1].mxu0 }
 0x105   : > { %v468_v13 = vpop.f32.mrb[2].mxu0 }
 0x106   : > { %v900_v14 = vpop.f32.mrb[3].mxu0 }
 0x107 PF: > { %v488_v15 = vlaneseq  ;;  %v846_v16 = vld.sshfl [vmem:[%s336_s10] sm:$0x11 pattern:$0x75316420]  ;;  %v1007_v19 = vmov 1966171168  }
 0x108   : > { %v515_v17 = vld [vmem:[%s350_s16] sm:$0x3]  ;;  %v486_v20 = vunpack.c.l.s4 %v1007_v19  ;;  %v1008_v22 = vmov 0.0   ;;  %v962_v23 = vld [vmem:[%s1200_s4 + $0x8] sm:$0xff]   ;;  %v484_v26 = vcombine.high %v846_v16, %v846_v16  ;;  %v963_v30 = vld [vmem:[%s1200_s4 + $0x10] sm:$0xff]   ;;  %vm1009_vm1 = vmmov 0  }
 0x109   : > { %v961_v18 = vld [vmem:[%s1200_s4] sm:$0xff]   ;;  %v489_v21 = vshrl.u32 %v488_v15, 7  ;;  %901 = vmatprep.subr.bf16.mxu0 %v1008_v22  ;;  %917 = vmatprep.mubr.msk.bf16.mxu0 %vm1009_vm1, %v1008_v22  ;;  %v1148_v37 = vld [vmem:[#allocation2 + $0x8] sm:$0xff]  ;;  %v964_v38 = vld [vmem:[%s1200_s4 + $0x18] sm:$0xff]   ;;  %v1010_v46 = vmov 0   ;;  %s472_s23 = sld [smem:[#allocation4]] }
 0x10a   : > { %902 = vmatpush3.bf16.msra.mxu0 %v961_v18  ;;  %v487_v24 = vunpack.c.0.s8 %v486_v20  ;;  %v1144_v34 = vld [vmem:[#allocation2] sm:$0xff]  ;;  %v966_v42 = vld [vmem:[%s1200_s4 + $0x28] sm:$0xff]   ;;  %v967_v43 = vld [vmem:[%s1200_s4 + $0x30] sm:$0xff]   ;;  %959 = vset.pattern.permute.xlu0 %v1010_v46  ;;  %p858_p6 = scmp.ne.s32.totalorder %s995_s26, 7 }
 0x10b   : > { %v1134_v25 = vsub.s32 0, %v489_v21  ;;  %v526_v27 = vsub.s32 1, %v489_v21  ;;  %903 = vmatprep.subr.bf16.mxu0 %v1008_v22  ;;  %v965_v41 = vld [vmem:[%s1200_s4 + $0x20] sm:$0xff]   ;;  %v968_v44 = vld [vmem:[%s1200_s4 + $0x38] sm:$0xff]   ;;  %v547_v45 = vpack.c.bf16 %v1148_v37, %v1144_v34  ;;  %960 = vset.pattern.permute.xlu1 %v1010_v46  ;;  %v653_v4 = vld [vmem:[#allocation3] sm:$0xff] }
 0x10c   : > { %v1136_v28 = vsub.s32 %v487_v24, %v489_v21  ;;  %v857_v1 = vld.sshfl [vmem:[%s343_s13] sm:$0x11 pattern:$0x75316420] }
 0x10d   : > { %v520_v29 = vrot.slane %v515_v17, %v1134_v25  ;;  %v527_v33 = vrot.slane %v515_v17, %v526_v27  ;;  %v665_v3 = vcombine.high %v857_v1, %v857_v1 }
 0x10e   : > { %904 = vmatpush3.bf16.msra.mxu0 %v962_v23  ;;  %v491_v31 = vrot.slane %v846_v16, %v1136_v28  ;;  %v498_v32 = vrot.slane %v484_v26, %v1136_v28  ;;  %v672_v2 = vrot.slane %v857_v1, %v1136_v28 }
 0x10f   : > { %522 = vbcast.lane.b32.xlu1 %v520_v29, 256  ;;  %905 = vmatprep.subr.bf16.mxu0 %v1008_v22  ;;  %v679_v7 = vrot.slane %v665_v3, %v1136_v28  ;;  %v694_v11 = vstv %s472_s23 }
 0x110   : > { %v502_v35 = vrot.slane %v491_v31, %v1134_v25  ;;  %v506_v36 = vrot.slane %v498_v32, %v1134_v25  ;;  %v683_v6 = vrot.slane %v672_v2, %v1134_v25 }
 0x111   : > { %v687_v10 = vrot.slane %v679_v7, %v1134_v25 }
 0x112   : > { %906 = vmatpush3.bf16.msra.mxu0 %v963_v30  ;;  %v509_v39 = vmul.f32 %v502_v35, %v1144_v34  ;;  %v510_v40 = vmul.f32 %v506_v36, %v1148_v37 }
 0x113   : > { %529 = vbcast.lane.b32.xlu1 %v527_v33, 256  ;;  %907 = vmatprep.subr.bf16.mxu0 %v1008_v22 }
 0x114   : > { %511 = vadd.xlane.f32.xlu0 %v509_v39 }
 0x116   : > { %908 = vmatpush3.bf16.msra.mxu0 %v964_v38 }
 0x117   : > { %909 = vmatprep.subr.bf16.mxu0 %v1008_v22 }
 0x118   : > { %513 = vadd.xlane.f32.xlu0 %v510_v40 }
 0x11a   : > { %910 = vmatpush3.bf16.msra.mxu0 %v965_v41 }
 0x11b   : > { %911 = vmatprep.subr.bf16.mxu0 %v1008_v22 }
 0x11e   : > { %912 = vmatpush3.bf16.msra.mxu0 %v966_v42 }
 0x11f   : > { %913 = vmatprep.subr.bf16.mxu0 %v1008_v22 }
 0x122   : > { %914 = vmatpush3.bf16.msra.mxu0 %v967_v43 }
 0x123   : > { %915 = vmatprep.subr.bf16.mxu0 %v1008_v22 }
 0x126   : > { %916 = vmatpush3.bf16.msra.mxu0 %v968_v44 }
 0x129   : > { %918 = vmatmul.mubr.bf16.vlgmr.msra.gmra.mrb[0].mxu0 %v547_v45 }
 0x181   : > { %v523_v47 = vpop.permute.xlu1 %522 }
 0x185   : > { %v530_v50 = vpop.permute.xlu1 %529 }
 0x1a1   : > { %v512_v48 = vpop.xlane.xlu0 %511 }
 0x1a2   : > { %v533_v49 = vadd.f32 %v523_v47, %v512_v48 }
 0x1a4   : > { %v847_v51 = vmul.f32 -1.442695, %v533_v49 }
 0x1a5   : > { %v514_v52 = vpop.xlane.xlu0 %513 }
 0x1a6   : > { %969 = vpow2.f32 %v847_v51  ;;  %v534_v53 = vadd.f32 %v530_v50, %v514_v52 }
 0x1a8   : > { %v848_v54 = vmul.f32 -1.442695, %v534_v53 }
 0x1aa   : > { %971 = vpow2.f32 %v848_v54 }
 0x1b0   : > { %v970_v55 = vpop.eup %969 }
 0x1b1   : > { %v541_v56 = vadd.f32 1.0, %v970_v55 }
 0x1b3   : > { %973 = vrcp.f32 %v541_v56 }
 0x1b4   : > { %v972_v57 = vpop.eup %971 }
 0x1b5   : > { %v542_v58 = vadd.f32 1.0, %v972_v57 }
 0x1b7   : > { %975 = vrcp.f32 %v542_v58 }
 0x1bd   : > { %v974_v59 = vpop.eup %973 }
 0x1be   : > { %701 = vperm.xlu0 %959, %v974_v59  }
 0x1c1   : > { %v976_v60 = vpop.eup %975 }
 0x1c2   : > { %706 = vperm.xlu1 %960, %v976_v60  }
 0x1fc   : > { %v646_v61 = vpop.f32.mrb[0].mxu0 }
 0x1fd   : > { %v919_v62 = vpop.f32.mrb[1].mxu0  ;;  %v654_v5 = vadd.f32 %v653_v4, %v646_v61 }
 0x1fe   : > { %v649_v63 = vpop.f32.mrb[2].mxu0 }
 0x1ff   : > { %v920_v0 = vpop.f32.mrb[3].mxu0  ;;  %v690_v8 = vadd.f32 %v683_v6, %v654_v5  ;;  %v655_v9 = vadd.f32 %v653_v4, %v649_v63 }
 0x201   : > { %v691_v12 = vadd.f32 %v687_v10, %v655_v9  ;;  %v695_v13 = vmul.f32 %v694_v11, %v690_v8  ;;  %vm692_vm2 = vcmp.ge.f32.partialorder %v690_v8, 0.0 }
 0x203   : > { %v697_v15 = vsel %vm692_vm2, %v690_v8, %v695_v13  ;;  %v696_v16 = vmul.f32 %v694_v11, %v691_v12  ;;  %vm693_vm3 = vcmp.ge.f32.partialorder %v691_v12, 0.0 }
 0x205   : > { %v698_v20 = vsel %vm693_vm3, %v691_v12, %v696_v16 }
 0x23d   : > { %v702_v14 = vpop.permute.xlu0 %701 }
 0x23e   : > { %v709_v17 = vmul.f32 %v702_v14, %v697_v15 }
 0x240   : > { %v711_v18 = vadd.f32 %v709_v17, %v1144_v34 }
 0x241   : > { %v707_v19 = vpop.permute.xlu1 %706 }
 0x242   : > { %v710_v21 = vmul.f32 %v707_v19, %v698_v20  ;;  %v713_v22 = vmul.f32 %v711_v18, %v711_v18 }
 0x244   : > { %v712_v23 = vadd.f32 %v710_v21, %v1148_v37  ;;  %715 = vadd.xlane.f32.xlu1 %v713_v22 }
 0x246   : > { %v714_v24 = vmul.f32 %v712_v23, %v712_v23 }
 0x248   : > { %717 = vadd.xlane.f32.xlu1 %v714_v24 }
 0x2d1   : > { %v716_v25 = vpop.xlane.xlu1 %715 }
 0x2d2   : > { %v719_v26 = vmax.f32 %v716_v25, 1e-24 }
 0x2d4   : > { %977 = vrsqrt.f32 %v719_v26 }
 0x2d5   : > { %v718_v27 = vpop.xlane.xlu1 %717 }
 0x2d6   : > { %v720_v28 = vmax.f32 %v718_v27, 1e-24 }
 0x2d8   : > { %979 = vrsqrt.f32 %v720_v28 }
 0x2de   : > { %v978_v29 = vpop.eup %977 }
 0x2df   : > { %v723_v30 = vmul.f32 %v978_v29, %v711_v18  ;;  %730 = sbr.rel (%p858_p6) target bundleno = 750 (0x2ee), region = 56 }
 0x2e1   : > { %725 = vst [vmem:[#allocation2] sm:$0xff] %v723_v30 }
 0x2e2   : > { %v980_v31 = vpop.eup %979 }
 0x2e3   : > { %v724_v32 = vmul.f32 %v980_v31, %v712_v23 }
 0x2e5   : > { %726 = vst [vmem:[#allocation2 + $0x8] sm:$0xff] %v724_v32 }
 0x2e8   : > { %v731_v33 = vld [vmem:[#allocation2] sm:$0xff] }
 0x2e9   : > { %733 = vst [vmem:[%s1203_s7] sm:$0xff] %v731_v33 }
 0x2ec   : > { %v732_v34 = vld [vmem:[#allocation2 + $0x8] sm:$0xff] }
 0x2ed   : > { %734 = vst [vmem:[%s1203_s7 + $0x8] sm:$0xff] %v732_v34 }
 0x2ee PF: > { %s18_s28 = sadd.s32 1, %s1003_s28   ;;  %s1204_s26 = smov %s999_s27 }
 0x2ef   : > { %p15_p7 = scmp.ge.s32.totalorder %s18_s28, 10   ;;  %s1205_s27 = smov %s1207_s6 }
 0x2f1   :  { %17 = sbr.rel (!%p15_p7) target bundleno = 2 (0x2), region = 92 }

// kernel: entnet_forward.9
= control target key start
LH: loop header
LB: loop body
LE: loop exit
PB: predicated region body
PF: predicated region fallthrough
CT: control target
= control target key end

     0   :  { %v41_v0 = vlaneseq  ;;  %v512_v1 = vmov 1966171168   ;;  %s677_s0 = inlined_call_operand.vmem [shape: f32[2,128], index: 0, kind: input, shape index: {}]   ;;  %s678_s1 = inlined_call_operand.vmem [shape: f32[2,8,128], index: 1, kind: input, shape index: {}]   ;;  %s679_s2 = inlined_call_operand.vmem [shape: bf16[128,128], index: 2, kind: input, shape index: {}]   ;;  %s680_s3 = inlined_call_operand.vmem [shape: f32[1,128], index: 3, kind: input, shape index: {}]   ;;  %s681_s4 = inlined_call_operand.vmem [shape: bf16[128,128], index: 4, kind: input, shape index: {}]   ;;  %s682_s5 = inlined_call_operand.vmem [shape: f32[1,128], index: 5, kind: input, shape index: {}]   ;;  %s683_s6 = inlined_call_operand.<no memory space> [shape: f32[1], index: 6, kind: input, shape index: {}]   ;;  %s684_s7 = inlined_call_operand.hbm [shape: f32[2,128], index: 7, kind: output, shape index: {}]  }
   0x1   :  { %v39_v2 = vunpack.c.l.s4 %v512_v1  ;;  %v559_v3 = vld [vmem:[%s677_s0] sm:$0x3]  ;;  %v577_v14 = vld [vmem:[%s678_s1 + $0x8] sm:$0xff] }
   0x2   :  { %v561_v4 = vshrl.u32 %v41_v0, 7  ;;  %v571_v9 = vld [vmem:[%s678_s1] sm:$0xff] }
   0x3   :  { %v40_v5 = vunpack.c.0.s8 %v39_v2 }
   0x4   :  { %v564_v6 = vsub.s32 0, %v561_v4 }
   0x5   :  { %v43_v7 = vsub.s32 %v40_v5, %v561_v4 }
   0x7   :  { %v44_v8 = vrot.slane %v559_v3, %v43_v7 }
   0x9   :  { %v52_v10 = vrot.slane %v44_v8, %v43_v7  ;;  %v45_v11 = vcombine.high %v44_v8, %v44_v8 }
   0xb   :  { %v63_v12 = vrot.slane %v52_v10, %v564_v6  ;;  %v59_v13 = vrot.slane %v45_v11, %v43_v7 }
   0xc   :  { %13 = vsyncpa [#allocation5], 0  ;;  %v77_v18 = vand.u32 127, %v41_v0  ;;  %vm89_vm0 = vcmask 1041409   ;;  %vm93_vm2 = vcmask 58368   ;;  %v468_v32 = vld [vmem:[%s679_s2] sm:$0xff]  }
   0xd   :  { %v70_v15 = vmul.f32 %v63_v12, %v571_v9  ;;  %v67_v16 = vrot.slane %v59_v13, %v564_v6  ;;  %v513_v33 = vmov 0.0   ;;  %v469_v34 = vld [vmem:[%s679_s2 + $0x8] sm:$0xff]   ;;  %v470_v35 = vld [vmem:[%s679_s2 + $0x10] sm:$0xff]   ;;  %v471_v37 = vld [vmem:[%s679_s2 + $0x18] sm:$0xff]   ;;  %v114_v39 = vsub.s32 1, %v561_v4 }
   0xe   :  { %v83_v20 = vsub.s32 %v77_v18, %v561_v4  ;;  %vm78_vm1 = vcmp.lt.s32.totalorder %v77_v18, 8  ;;  %424 = vmatprep.subr.bf16.mxu0 %v513_v33  ;;  %444 = vmatprep.subr.bf16.mxu1 %v513_v33  ;;  %v472_v38 = vld [vmem:[%s679_s2 + $0x20] sm:$0xff]   ;;  %v473_v41 = vld [vmem:[%s679_s2 + $0x28] sm:$0xff]   ;;  %v474_v45 = vld [vmem:[%s679_s2 + $0x30] sm:$0xff]   ;;  %vm514_vm3 = vmmov 0   ;;  %v256_v18 = vstv %s683_s6 }
   0xf   :  { %72 = vadd.xlane.f32.xlu0 %v70_v15  ;;  %v71_v17 = vmul.f32 %v67_v16, %v577_v14  ;;  %425 = vmatpush3.bf16.msra.mxu0 %v468_v32  ;;  %v475_v46 = vld [vmem:[%s679_s2 + $0x38] sm:$0xff]   ;;  %v476_v47 = vld [vmem:[%s681_s4] sm:$0xff]   ;;  %v477_v48 = vld [vmem:[%s681_s4 + $0x8] sm:$0xff]  }
  0x10   :  { %426 = vmatprep.subr.bf16.mxu0 %v513_v33  ;;  %440 = vmatprep.mubr.msk.bf16.mxu0 %vm514_vm3, %v513_v33  ;;  %v478_v49 = vld [vmem:[%s681_s4 + $0x10] sm:$0xff]   ;;  %v479_v50 = vld [vmem:[%s681_s4 + $0x18] sm:$0xff]   ;;  %v481_v11 = vld [vmem:[%s681_s4 + $0x28] sm:$0xff]  }
  0x11   :  { %460 = vmatprep.mubr.msk.bf16.mxu1 %vm514_vm3, %v513_v33  ;;  %445 = vmatpush3.bf16.msra.mxu1 %v476_v47  ;;  %v482_v12 = vld [vmem:[%s681_s4 + $0x30] sm:$0xff]   ;;  %v483_v13 = vld [vmem:[%s681_s4 + $0x38] sm:$0xff]   ;;  %v396_v15 = vld [vmem:[%s680_s3] ss:$0 sm:$0xff]  ;;  %s515_s3 = smov [#allocation4]  }
  0x12   :  { %446 = vmatprep.subr.bf16.mxu1 %v513_v33  ;;  %s380_s16 = sshll.u32 %s515_s3, 4  ;;  %s381_s16 = int_to_ptr.vmem [resolvable:$true] %s380_s16 }
  0x13   :  { %74 = vadd.xlane.f32.xlu0 %v71_v17  ;;  %427 = vmatpush3.bf16.msra.mxu0 %v469_v34  ;;  %s488_s6 = scalar_lea.vmem %s381_s16, 32  ;;  %p493_p1 = scmp.lt.s32.totalorder %s381_s16, %s381_s16 }
  0x14   :  { %428 = vmatprep.subr.bf16.mxu0 %v513_v33  ;;  %p489_p0 = scmp.ne.s32.totalorder %s381_s16, %s488_s6  ;;  %p494_p2 = scmp.lt.s32.totalorder %s488_s6, %s488_s6 }
  0x15   :  { %447 = vmatpush3.bf16.msra.mxu1 %v477_v48 }
  0x16   :  { %448 = vmatprep.subr.bf16.mxu1 %v513_v33  ;;  %p495_p3 = por %p494_p2, %p493_p1 }
  0x17   :  { %429 = vmatpush3.bf16.msra.mxu0 %v470_v35 }
  0x18   :  { %430 = vmatprep.subr.bf16.mxu0 %v513_v33  ;;  %p496_p4 = pnand %p495_p3, %p489_p0 }
  0x19   :  { %449 = vmatpush3.bf16.msra.mxu1 %v478_v49 }
  0x1a   :  { %450 = vmatprep.subr.bf16.mxu1 %v513_v33 }
  0x1b   :  { %431 = vmatpush3.bf16.msra.mxu0 %v471_v37 }
  0x1c   :  { %432 = vmatprep.subr.bf16.mxu0 %v513_v33 }
  0x1d   :  { %451 = vmatpush3.bf16.msra.mxu1 %v479_v50 }
  0x1e   :  { %452 = vmatprep.subr.bf16.mxu1 %v513_v33 }
  0x1f   :  { %433 = vmatpush3.bf16.msra.mxu0 %v472_v38 }
  0x20   :  { %434 = vmatprep.subr.bf16.mxu0 %v513_v33 }
  0x23   :  { %435 = vmatpush3.bf16.msra.mxu0 %v473_v41 }
  0x24   :  { %436 = vmatprep.subr.bf16.mxu0 %v513_v33 }
  0x27   :  { %437 = vmatpush3.bf16.msra.mxu0 %v474_v45 }
  0x28   :  { %438 = vmatprep.subr.bf16.mxu0 %v513_v33 }
  0x2b   :  { %439 = vmatpush3.bf16.msra.mxu0 %v475_v46 }
  0x9c   :  { %v73_v19 = vpop.xlane.xlu0 %72 }
  0x9d   :  { %v84_v22 = vrot.slane %v73_v19, %v83_v20 }
  0xa0   :  { %v75_v21 = vpop.xlane.xlu0 %74 }
  0xa1   :  { %v88_v23 = vrot.slane %v75_v21, %v83_v20 }
  0xa3   :  { %v90_v24 = vsel %vm89_vm0, %v88_v23, %v84_v22 }
  0xa4   :  { %v92_v25 = vsel %vm78_vm1, %v90_v24, -1e+30 }
  0xa5   :  { %v94_v26 = vsel %vm93_vm2, %v92_v25, -inf }
  0xa6   :  { %95 = vmax.xlane.f32.xlu1 %v94_v26  ;;  %v397_v26 = vld [vmem:[%s682_s5] ss:$0 sm:$0xff] }
 0x133   :  { %v96_v27 = vpop.xlane.xlu1 %95 }
 0x134   :  { %v97_v28 = vsub.f32 %v92_v25, %v96_v27 }
 0x136   :  { %v98_v29 = vmul.f32 1.442695, %v97_v28 }
 0x138   :  { %484 = vpow2.f32 %v98_v29 }
 0x142   :  { %v485_v30 = vpop.eup %484 }
 0x143   :  { %v100_v31 = vsel %vm93_vm2, %v485_v30, 0.0 }
 0x144   :  { %101 = vadd.xlane.f32.xlu1 %v100_v31 }
 0x1d1   :  { %v102_v36 = vpop.xlane.xlu1 %101 }
 0x1d2   :  { %486 = vrcp.f32 %v102_v36 }
 0x1dc   :  { %v487_v40 = vpop.eup %486 }
 0x1dd   :  { %v104_v42 = vmul.f32 %v487_v40, %v485_v30 }
 0x1df   :  { %v115_v43 = vrot.slane %v104_v42, %v114_v39  ;;  %v108_v44 = vrot.slane %v104_v42, %v564_v6 }
 0x1e1   :  { %117 = vbcast.lane.b32.xlu1 %v115_v43, 256  ;;  %110 = vbcast.lane.b32.xlu0 %v108_v44, 256 }
 0x253   :  { %v118_v51 = vpop.permute.xlu1 %117  ;;  %v111_v52 = vpop.permute.xlu0 %110 }
 0x254   :  { %v120_v53 = vmul.f32 %v118_v51, %v577_v14  ;;  %v119_v54 = vmul.f32 %v111_v52, %v571_v9  ;;  %v480_v9 = vld [vmem:[%s681_s4 + $0x20] sm:$0xff]  }
 0x255   :  { %453 = vmatpush3.bf16.msra.mxu1 %v480_v9 }
 0x256   :  { %v127_v55 = vrot.slane %v120_v53, 4  ;;  %v121_v56 = vrot.slane %v119_v54, 4  ;;  %454 = vmatprep.subr.bf16.mxu1 %v513_v33 }
 0x258   :  { %v128_v57 = vadd.f32 %v127_v55, %v120_v53  ;;  %v122_v58 = vadd.f32 %v121_v56, %v119_v54 }
 0x259   :  { %455 = vmatpush3.bf16.msra.mxu1 %v481_v11 }
 0x25a   :  { %v129_v59 = vrot.slane %v128_v57, 2  ;;  %v123_v60 = vrot.slane %v122_v58, 2  ;;  %456 = vmatprep.subr.bf16.mxu1 %v513_v33 }
 0x25c   :  { %v130_v61 = vadd.f32 %v129_v59, %v128_v57  ;;  %v124_v62 = vadd.f32 %v123_v60, %v122_v58 }
 0x25d   :  { %457 = vmatpush3.bf16.msra.mxu1 %v482_v12 }
 0x25e   :  { %v131_v63 = vrot.slane %v130_v61, 1  ;;  %v125_v0 = vrot.slane %v124_v62, 1  ;;  %458 = vmatprep.subr.bf16.mxu1 %v513_v33 }
 0x260   :  { %v132_v1 = vadd.f32 %v131_v63, %v130_v61  ;;  %v126_v2 = vadd.f32 %v125_v0, %v124_v62 }
 0x261   :  { %459 = vmatpush3.bf16.msra.mxu1 %v483_v13 }
 0x262   :  { %v134_v4 = vpack.c.bf16 %v132_v1, %v132_v1  ;;  %v133_v5 = vpack.c.bf16 %v126_v2, %v126_v2 }
 0x264   :  { %v154_v6 = vunpack.c.l.b16 %v134_v4  ;;  %v153_v7 = vunpack.c.l.b16 %v133_v5 }
 0x266   :  { %v155_v8 = vsel %vm89_vm0, %v154_v6, %v153_v7 }
 0x267   :  { %v156_v10 = vpack.c.b16 %v155_v8, %v155_v8 }
 0x269   :  { %441 = vmatmul.mubr.bf16.vlgmr.msra.gmra.mrb[0].mxu0 %v156_v10 }
 0x33c   :  { %v240_v14 = vpop.f32.mrb[0].mxu0 }
 0x33d   :  { %v246_v16 = vadd.f32 %v240_v14, %v559_v3  ;;  %v442_v17 = vpop.f32.mrb[1].mxu0 }
 0x33e   :  { %v243_v19 = vpop.f32.mrb[2].mxu0 }
 0x33f   :  { %v254_v20 = vadd.f32 %v396_v15, %v246_v16  ;;  %v443_v21 = vpop.f32.mrb[3].mxu0 }
 0x341   :  { %vm255_vm4 = vcmp.ge.f32.partialorder %v254_v20, 0.0  ;;  %v257_v22 = vmul.f32 %v256_v18, %v254_v20 }
 0x343   :  { %v258_v23 = vsel %vm255_vm4, %v254_v20, %v257_v22 }
 0x344   :  { %259 = vst [vmem:[#allocation2] sm:$0x3] %v258_v23 }
 0x34b   :  { %v260_v24 = vld [vmem:[#allocation2] sm:$0x3] }
 0x34c   :  { %v261_v25 = vpack.c.bf16 %v260_v24, %v260_v24 }
 0x34e   :  { %461 = vmatmul.mubr.bf16.vlgmr.msra.gmra.mrb[0].mxu1 %v261_v25 }
 0x421   :  { %v367_v3 = vpop.f32.mrb[0].mxu1 }
 0x422   :  { %v368_v27 = vadd.f32 %v397_v26, %v367_v3  ;;  %v462_v28 = vpop.f32.mrb[1].mxu1 }
 0x423   :  { %v370_v29 = vpop.f32.mrb[2].mxu1 }
 0x424   :  { %373 = vst [vmem:[#allocation4] sm:$0x3] %v368_v27  ;;  %v463_v30 = vpop.f32.mrb[3].mxu1 }
 0x425   :  { %499 = shalt.err (!%p496_p4)
}
 0x426   :  { %s500_s5 = scalar_lea.hbm %s684_s7, 32 }
 0x427   :  { %p501_p5 = scmp.ne.s32.totalorder %s684_s7, %s500_s5  ;;  %p504_p6 = scmp.lt.u32.totalorder %s500_s5, %s684_s7 }
 0x429   :  { %p506_p7 = pnand %p504_p6, %p501_p5 }
 0x42b   :  { %509 = shalt.err (!%p506_p7)
}
 0x42c   :  { %383 = dma.vmem_to_hbm [thread:$0]  %s381_s16, 32, %s684_s7, [#allocation5]  }
 0x42d   :  { %510 = dma.done.wait [#allocation5], 32  }
 0x42e   :  { %511 = vsyncadd [#allocation5], 4294967264 }
 0x42f   :  { %387 = vsyncpa [#allocation5], 1 }

</bundles_post_ra>
